<compile_context>
chip_gen: v7x
topology: tpu7x:2x2x1
jax: 0.10.0
libtpu: 0.0.40
codegen_flags: <defaults>
</compile_context>

<pallas_src>
import math
import functools

import jax
import jax.numpy as jnp
from jax.experimental import pallas as pl
from jax.experimental.pallas import tpu as pltpu


def _hw_config():
    """Per-chip sizing: bigger tiles / higher scoped VMEM on 128 MiB parts (v5e/v6e),
    conservative settings for 64 MiB v7x (also the fallback if detection fails)."""
    vmem_limit, tm, tn, tk = 40 * 1024 * 1024, 256, 512, 512
    try:
        info = pltpu.get_tpu_info()
        cap = getattr(info, "vmem_capacity_bytes", 0) or 0
        if cap >= 100 * 1024 * 1024:
            vmem_limit, tm, tn, tk = 64 * 1024 * 1024, 512, 1024, 512
    except Exception:
        pass
    return vmem_limit, tm, tn, tk


_VMEM_LIMIT, _TM, _TN, _TK = _hw_config()


def _pick_tile(dim, target, align):
    """Largest tile <= target that divides dim and is a multiple of align; otherwise the
    full dim (a block equal to the full array dim is always legal on TPU).  The vocab
    head avoids the full-dim fallback by padding vocab to a multiple of 256 at init."""
    if dim <= target:
        return dim
    t = (target // align) * align
    while t >= align:
        if dim % t == 0:
            return t
        t -= align
    return dim


# ----------------------------- Pallas kernels -----------------------------

def _matmul_kernel(x_ref, w_ref, b_ref, o_ref, acc_ref, *, relu, nk):
    # y = x @ w + b (+ ReLU); x/w bf16 on the MXU, f32 accumulation in VMEM scratch.
    k = pl.program_id(2)

    @pl.when(k == 0)
    def _():
        acc_ref[...] = jnp.zeros_like(acc_ref)

    acc_ref[...] += jnp.dot(x_ref[...], w_ref[...],
                            preferred_element_type=jnp.float32)

    @pl.when(k == nk - 1)
    def _():
        y = acc_ref[...] + b_ref[...]
        if relu:
            y = jnp.maximum(y, 0.0)
        o_ref[...] = y.astype(o_ref.dtype)


def linear(x, w, b, relu=False, out_dtype=jnp.bfloat16):
    # x: (M, K) bf16, w: (K, N) bf16, b: (N,) f32 -> (M, N) out_dtype
    M, K = x.shape
    N = w.shape[1]
    tm = _pick_tile(M, _TM, 16)          # 16-row alignment: bf16 packs 2 rows / sublane
    tn = _pick_tile(N, _TN, 128)
    tk = _pick_tile(K, _TK, 128)
    nm, nn, nk = M // tm, N // tn, K // tk
    return pl.pallas_call(
        functools.partial(_matmul_kernel, relu=relu, nk=nk),
        out_shape=jax.ShapeDtypeStruct((M, N), out_dtype),
        grid=(nm, nn, nk),
        in_specs=[
            pl.BlockSpec((tm, tk), lambda i, j, k: (i, k)),
            pl.BlockSpec((tk, tn), lambda i, j, k: (k, j)),
            pl.BlockSpec((1, tn), lambda i, j, k: (0, j)),
        ],
        out_specs=pl.BlockSpec((tm, tn), lambda i, j, k: (i, j)),
        scratch_shapes=[pltpu.VMEM((tm, tn), jnp.float32)],
        compiler_params=pltpu.CompilerParams(
            dimension_semantics=("parallel", "parallel", "arbitrary"),
            vmem_limit_bytes=_VMEM_LIMIT),
    )(x, w, b.reshape(1, N))


def _matmul_ln_kernel(x_ref, w_ref, b_ref, r_ref, g_ref, bt_ref, o_ref, acc_ref, *, nk, eps):
    # y = LayerNorm(residual + (x @ w + b)) * gamma + beta   (post-norm, norm_first=False)
    # Output block spans the full d_model so the row reduction stays inside one block.
    k = pl.program_id(1)

    @pl.when(k == 0)
    def _():
        acc_ref[...] = jnp.zeros_like(acc_ref)

    acc_ref[...] += jnp.dot(x_ref[...], w_ref[...],
                            preferred_element_type=jnp.float32)

    @pl.when(k == nk - 1)
    def _():
        y = acc_ref[...] + b_ref[...] + r_ref[...].astype(jnp.float32)
        mu = jnp.mean(y, axis=-1, keepdims=True)
        var = jnp.mean((y - mu) ** 2, axis=-1, keepdims=True)
        o_ref[...] = ((y - mu) * jax.lax.rsqrt(var + eps) * g_ref[...]
                      + bt_ref[...]).astype(o_ref.dtype)


def linear_ln_residual(x, w, b, resid, gamma, beta, eps=1e-5):
    # LayerNorm(resid + x @ w + b), fused.  x: (M,K) bf16, w: (K,D) bf16, resid: (M,D) bf16.
    M, K = x.shape
    D = w.shape[1]
    tm = _pick_tile(M, _TM, 16)
    tk = _pick_tile(K, _TK, 128)
    nm, nk = M // tm, K // tk
    return pl.pallas_call(
        functools.partial(_matmul_ln_kernel, nk=nk, eps=eps),
        out_shape=jax.ShapeDtypeStruct((M, D), jnp.bfloat16),
        grid=(nm, nk),
        in_specs=[
            pl.BlockSpec((tm, tk), lambda i, k: (i, k)),
            pl.BlockSpec((tk, D), lambda i, k: (k, 0)),
            pl.BlockSpec((1, D), lambda i, k: (0, 0)),
            pl.BlockSpec((tm, D), lambda i, k: (i, 0)),
            pl.BlockSpec((1, D), lambda i, k: (0, 0)),
            pl.BlockSpec((1, D), lambda i, k: (0, 0)),
        ],
        out_specs=pl.BlockSpec((tm, D), lambda i, k: (i, 0)),
        scratch_shapes=[pltpu.VMEM((tm, D), jnp.float32)],
        compiler_params=pltpu.CompilerParams(
            dimension_semantics=("parallel", "arbitrary"),
            vmem_limit_bytes=_VMEM_LIMIT),
    )(x, w, b.reshape(1, D), resid, gamma.reshape(1, D), beta.reshape(1, D))


def _attn_kernel(q_ref, k_ref, v_ref, *rest, has_mask):
    # One (batch, head, q-tile) per grid step; head-major operands so there is NO
    # per-head slicing / relayout inside the kernel — just two 2-D MXU matmuls.
    if has_mask:
        m_ref, o_ref = rest
    else:
        (o_ref,) = rest

    q = q_ref[0, 0]                       # (tq, dh) bf16 (1/sqrt(dh) pre-folded into Wq)
    k = k_ref[0, 0]                       # (S,  dh) bf16
    v = v_ref[0, 0]                       # (S,  dh) bf16

    # scores = q @ k^T expressed directly via dot_general (no materialized transpose).
    s = jax.lax.dot_general(q, k, (((1,), (1,)), ((), ())),
                            preferred_element_type=jnp.float32)      # (tq, S) f32
    if has_mask:
        s = s + m_ref[...]                                           # additive float mask
    s = s - jnp.max(s, axis=-1, keepdims=True)
    p = jnp.exp(s)
    p = p * pl.reciprocal(jnp.sum(p, axis=-1, keepdims=True), approx=True)

    o = jnp.dot(p.astype(jnp.bfloat16), v, preferred_element_type=jnp.float32)
    o_ref[0, 0] = o.astype(o_ref.dtype)


def multihead_attention(q, k, v, mask=None):
    # q, k, v: (N, nhead, S, dh) bf16 head-major -> (N, nhead, S, dh) bf16
    # TODO(synk): add flash-style KV tiling (online softmax) for S >~ 1k on v7x.
    N, H, S, dh = q.shape
    tq = _pick_tile(S, 256, 8)
    has_mask = mask is not None

    in_specs = [
        pl.BlockSpec((1, 1, tq, dh), lambda n, h, qi: (n, h, qi, 0)),
        pl.BlockSpec((1, 1, S, dh), lambda n, h, qi: (n, h, 0, 0)),
        pl.BlockSpec((1, 1, S, dh), lambda n, h, qi: (n, h, 0, 0)),
    ]
    args = [q, k, v]
    if has_mask:
        in_specs.append(pl.BlockSpec((tq, S), lambda n, h, qi: (qi, 0)))
        args.append(mask)

    return pl.pallas_call(
        functools.partial(_attn_kernel, has_mask=has_mask),
        out_shape=jax.ShapeDtypeStruct((N, H, S, dh), jnp.bfloat16),
        grid=(N, H, S // tq),
        in_specs=in_specs,
        out_specs=pl.BlockSpec((1, 1, tq, dh), lambda n, h, qi: (n, h, qi, 0)),
        compiler_params=pltpu.CompilerParams(
            dimension_semantics=("parallel", "parallel", "parallel"),
            vmem_limit_bytes=_VMEM_LIMIT),
    )(*args)


# ----------------------------- model glue (plain JAX, jitted) -----------------------------

def make_positional_encoding(max_len, d_model):
    position = jnp.arange(max_len, dtype=jnp.float32)[:, None]
    div_term = jnp.exp(jnp.arange(0, d_model, 2, dtype=jnp.float32)
                       * (-math.log(10000.0) / d_model))
    pe = jnp.zeros((max_len, d_model), jnp.float32)
    pe = pe.at[:, 0::2].set(jnp.sin(position * div_term))
    pe = pe.at[:, 1::2].set(jnp.cos(position * div_term))
    return pe


def init_params(key, vocab_size, d_model, nhead, num_layers, dim_ff, max_len=128):
    keys = jax.random.split(key, 2 + num_layers)
    dh = d_model // nhead

    def dense(k, fan_in, fan_out):
        kw, kb = jax.random.split(k)
        lim = 1.0 / math.sqrt(fan_in)
        w = jax.random.uniform(kw, (fan_in, fan_out), jnp.float32, -lim, lim)
        b = jax.random.uniform(kb, (fan_out,), jnp.float32, -lim, lim)
        return w, b

    # sqrt(d_model) embedding scale folded into the table (no extra kernel needed).
    emb = jax.random.normal(keys[0], (vocab_size, d_model), jnp.float32) * math.sqrt(d_model)

    # Vocab head padded to a multiple of 256 lanes: lane-dense unmasked stores and a
    # bounded output tile; the wrapper slices the logits back to vocab_size.
    vpad = ((vocab_size + 255) // 256) * 256
    fc_w, fc_b = dense(keys[1], d_model, vocab_size)
    fc_w = jnp.pad(fc_w, ((0, 0), (0, vpad - vocab_size)))
    fc_b = jnp.pad(fc_b, ((0, vpad - vocab_size),))

    layers = []
    for l in range(num_layers):
        lk = jax.random.split(keys[2 + l], 4)
        in_w, in_b = dense(lk[0], d_model, 3 * d_model)
        # Fold the 1/sqrt(dh) attention scale into the Q projection (free at init).
        q_scale = 1.0 / math.sqrt(dh)
        in_w = in_w.at[:, :d_model].multiply(q_scale)
        in_b = in_b.at[:d_model].multiply(q_scale)
        op_w, op_b = dense(lk[1], d_model, d_model)
        f1_w, f1_b = dense(lk[2], d_model, dim_ff)
        f2_w, f2_b = dense(lk[3], dim_ff, d_model)
        layers.append(dict(
            in_proj_w=in_w.astype(jnp.bfloat16), in_proj_b=in_b,
            out_proj_w=op_w.astype(jnp.bfloat16), out_proj_b=op_b,
            ff1_w=f1_w.astype(jnp.bfloat16), ff1_b=f1_b,
            ff2_w=f2_w.astype(jnp.bfloat16), ff2_b=f2_b,
            ln1_g=jnp.ones((d_model,), jnp.float32), ln1_b=jnp.zeros((d_model,), jnp.float32),
            ln2_g=jnp.ones((d_model,), jnp.float32), ln2_b=jnp.zeros((d_model,), jnp.float32),
        ))

    return dict(embedding_scaled=emb, pe=make_positional_encoding(max_len, d_model),
                layers=layers,
                fc_w=fc_w.astype(jnp.bfloat16), fc_b=fc_b)


def encoder_layer_forward(x_flat, p, N, S, d_model, nhead, mask):
    # x_flat: (N*S, d_model) bf16, batch-major rows (row = n*S + s)
    dh = d_model // nhead
    qkv = linear(x_flat, p["in_proj_w"], p["in_proj_b"])             # (N*S, 3*d_model) bf16
    qkv = qkv.reshape(N, S, 3, nhead, dh)
    # Head-major layout via cheap XLA transposes of the small bf16 activation
    # (keeps all per-head relayout OUT of the Pallas kernel).
    q = qkv[:, :, 0].transpose(0, 2, 1, 3)                            # (N, nhead, S, dh)
    k = qkv[:, :, 1].transpose(0, 2, 1, 3)
    v = qkv[:, :, 2].transpose(0, 2, 1, 3)
    attn = multihead_attention(q, k, v, mask)                         # (N, nhead, S, dh)
    attn = attn.transpose(0, 2, 1, 3).reshape(N * S, d_model)
    # out_proj fused with residual add + norm1
    x1 = linear_ln_residual(attn, p["out_proj_w"], p["out_proj_b"],
                            x_flat, p["ln1_g"], p["ln1_b"])
    h = linear(x1, p["ff1_w"], p["ff1_b"], relu=True)                 # linear1 + ReLU
    # linear2 fused with residual add + norm2
    x2 = linear_ln_residual(h, p["ff2_w"], p["ff2_b"],
                            x1, p["ln2_g"], p["ln2_b"])
    return x2


def transformer_generator_forward(params, src, src_mask=None, *, d_model, nhead, vocab_size):
    """src: (S, N) int32 token ids -> logits (S, N, vocab_size) bf16.
    src_mask (optional): additive float (S, S) mask (e.g. -inf causal mask).
    TODO(synk): boolean masks must be pre-converted to additive -inf masks;
    src_key_padding_mask is unsupported; dropout is identity (eval semantics)."""
    S, N = src.shape
    tokens = src.T                                                    # (N, S) batch-major
    x = jnp.take(params["embedding_scaled"], tokens, axis=0) + params["pe"][:S][None, :, :]
    x = x.astype(jnp.bfloat16).reshape(N * S, d_model)
    mask = None if src_mask is None else src_mask.astype(jnp.float32)

    for lp in params["layers"]:
        x = encoder_layer_forward(x, lp, N, S, d_model, nhead, mask)

    # Produce logits directly in (S, N, V) order: transpose the small d_model-wide
    # activation instead of the vocab-wide logits tensor.
    x_sn = x.reshape(N, S, d_model).transpose(1, 0, 2).reshape(S * N, d_model)
    logits = linear(x_sn, params["fc_w"], params["fc_b"])             # (S*N, Vpad) bf16
    return logits.reshape(S, N, -1)[:, :, :vocab_size]


# ----------------------------- demo -----------------------------

if __name__ == "__main__":
    vocab_size = 24
    d_model = 128
    nhead = 4
    num_layers = 2
    dim_ff = 256
    S, N = 8, 2  # seq len, batch

    key = jax.random.PRNGKey(0)
    pkey, tkey = jax.random.split(key)
    params = init_params(pkey, vocab_size, d_model, nhead, num_layers, dim_ff, max_len=64)
    src = jax.random.randint(tkey, (S, N), 0, vocab_size, dtype=jnp.int32)
    causal_mask = jnp.triu(jnp.full((S, S), float('-inf'), jnp.float32), k=1)

    fwd = jax.jit(functools.partial(transformer_generator_forward,
                                    d_model=d_model, nhead=nhead, vocab_size=vocab_size))
    out = jax.block_until_ready(fwd(params, src, causal_mask))

    assert out.shape == (S, N, vocab_size), out.shape
    assert bool(jnp.all(jnp.isfinite(out.astype(jnp.float32))))
    print("KERNEL_OK")
</pallas_src>

<mosaic_0001>
module attributes {stable_mosaic.version = 11 : i64} {
  func.func @_matmul_kernel(%arg0: i32, %arg1: i32, %arg2: i32, %arg3: memref<16x128xbf16, #tpu.memory_space<vmem>>, %arg4: memref<128x384xbf16, #tpu.memory_space<vmem>>, %arg5: memref<1x384xf32, #tpu.memory_space<vmem>>, %arg6: memref<16x384xbf16, #tpu.memory_space<vmem>>, %arg7: memref<16x384xf32, #tpu.memory_space<vmem>>) attributes {dimension_semantics = [#tpu.dimension_semantics<parallel>, #tpu.dimension_semantics<parallel>, #tpu.dimension_semantics<arbitrary>], iteration_bounds = array<i64: 1, 1, 1>, scalar_prefetch = 0 : i64, scratch_operands = 1 : i64, tpu.core_type = #tpu.core_type<tc>, window_params = [{transform_indices = @transform_0, window_bounds = array<i64: 16, 128>}, {transform_indices = @transform_1, window_bounds = array<i64: 128, 384>}, {transform_indices = @transform_2, window_bounds = array<i64: 1, 384>}, {transform_indices = @transform_3, window_bounds = array<i64: 16, 384>}]} {
    %c0_i32 = arith.constant 0 : i32
    %0 = arith.cmpi eq, %arg2, %c0_i32 : i32
    %1 = arith.extui %0 : i1 to i32
    %c0_i32_0 = arith.constant 0 : i32
    %2 = arith.cmpi ne, %1, %c0_i32_0 : i32
    scf.if %2 {
      %cst_10 = arith.constant 0.000000e+00 : f32
      %12 = vector.broadcast %cst_10 : f32 to vector<16x384xf32>
      %c0_11 = arith.constant 0 : index
      %c0_12 = arith.constant 0 : index
      %13 = vector.load %arg7[%c0_11, %c0_12] : memref<16x384xf32, #tpu.memory_space<vmem>>, vector<16x384xf32>
      tpu.vector_store %arg7[%c0_11, %c0_12], %12 {strides = array<i32>} : memref<16x384xf32, #tpu.memory_space<vmem>>, vector<16x384xf32>,
    } else {
    }
    %c0 = arith.constant 0 : index
    %c0_1 = arith.constant 0 : index
    %3 = vector.load %arg7[%c0, %c0_1] : memref<16x384xf32, #tpu.memory_space<vmem>>, vector<16x384xf32>
    %c0_2 = arith.constant 0 : index
    %c0_3 = arith.constant 0 : index
    %4 = vector.load %arg3[%c0_2, %c0_3] : memref<16x128xbf16, #tpu.memory_space<vmem>>, vector<16x128xbf16>
    %c0_4 = arith.constant 0 : index
    %c0_5 = arith.constant 0 : index
    %5 = vector.load %arg4[%c0_4, %c0_5] : memref<128x384xbf16, #tpu.memory_space<vmem>>, vector<128x384xbf16>
    %cst = arith.constant dense<0.000000e+00> : vector<16x384xf32>
    %6 = tpu.matmul %4, %5, %cst {dimension_numbers = #tpu.dot_dimension_numbers<[1], [0], [0], [1], [0, 0, 1, 1], [], []>} : vector<16x128xbf16>, vector<128x384xbf16>, vector<16x384xf32> -> vector<16x384xf32>
    %7 = arith.addf %3, %6 : vector<16x384xf32>
    %c0_6 = arith.constant 0 : index
    %c0_7 = arith.constant 0 : index
    %8 = vector.load %arg7[%c0_6, %c0_7] : memref<16x384xf32, #tpu.memory_space<vmem>>, vector<16x384xf32>
    tpu.vector_store %arg7[%c0_6, %c0_7], %7 {strides = array<i32>} : memref<16x384xf32, #tpu.memory_space<vmem>>, vector<16x384xf32>,
    %c0_i32_8 = arith.constant 0 : i32
    %9 = arith.cmpi eq, %arg2, %c0_i32_8 : i32
    %10 = arith.extui %9 : i1 to i32
    %c0_i32_9 = arith.constant 0 : i32
    %11 = arith.cmpi ne, %10, %c0_i32_9 : i32
    scf.if %11 {
      %c0_10 = arith.constant 0 : index
      %c0_11 = arith.constant 0 : index
      %12 = vector.load %arg7[%c0_10, %c0_11] : memref<16x384xf32, #tpu.memory_space<vmem>>, vector<16x384xf32>
      %c0_12 = arith.constant 0 : index
      %c0_13 = arith.constant 0 : index
      %13 = vector.load %arg5[%c0_12, %c0_13] : memref<1x384xf32, #tpu.memory_space<vmem>>, vector<1x384xf32>
      %14 = vector.broadcast %13 : vector<1x384xf32> to vector<16x384xf32>
      %15 = arith.addf %12, %14 : vector<16x384xf32>
      %16 = arith.truncf %15 : vector<16x384xf32> to vector<16x384xbf16>
      %c0_14 = arith.constant 0 : index
      %c0_15 = arith.constant 0 : index
      %17 = vector.load %arg6[%c0_14, %c0_15] : memref<16x384xbf16, #tpu.memory_space<vmem>>, vector<16x384xbf16>
      tpu.vector_store %arg6[%c0_14, %c0_15], %16 {strides = array<i32>} : memref<16x384xbf16, #tpu.memory_space<vmem>>, vector<16x384xbf16>,
    } else {
    }
    return
  }
  func.func @transform_0(%arg0: i32, %arg1: i32, %arg2: i32) -> (i32, i32) {
    %c0_i32 = arith.constant 0 : i32
    return %arg0, %arg2 : i32, i32
  }
  func.func @transform_1(%arg0: i32, %arg1: i32, %arg2: i32) -> (i32, i32) {
    %c0_i32 = arith.constant 0 : i32
    return %arg2, %arg1 : i32, i32
  }
  func.func @transform_2(%arg0: i32, %arg1: i32, %arg2: i32) -> (i32, i32) {
    %c0_i32 = arith.constant 0 : i32
    %c0_i32_0 = arith.constant 0 : i32
    return %c0_i32, %arg1 : i32, i32
  }
  func.func @transform_3(%arg0: i32, %arg1: i32, %arg2: i32) -> (i32, i32) {
    %c0_i32 = arith.constant 0 : i32
    return %arg0, %arg1 : i32, i32
  }
}

module attributes {stable_mosaic.version = 11 : i64} {
  func.func @_attn_kernel(%arg0: i32, %arg1: i32, %arg2: i32, %arg3: memref<1x1x8x32xbf16, #tpu.memory_space<vmem>>, %arg4: memref<1x1x8x32xbf16, #tpu.memory_space<vmem>>, %arg5: memref<1x1x8x32xbf16, #tpu.memory_space<vmem>>, %arg6: memref<8x8xf32, #tpu.memory_space<vmem>>, %arg7: memref<1x1x8x32xbf16, #tpu.memory_space<vmem>>) attributes {dimension_semantics = [#tpu.dimension_semantics<parallel>, #tpu.dimension_semantics<parallel>, #tpu.dimension_semantics<parallel>], iteration_bounds = array<i64: 2, 4, 1>, scalar_prefetch = 0 : i64, scratch_operands = 0 : i64, tpu.core_type = #tpu.core_type<tc>, window_params = [{transform_indices = @transform_0, window_bounds = array<i64: 1, 1, 8, 32>}, {transform_indices = @transform_1, window_bounds = array<i64: 1, 1, 8, 32>}, {transform_indices = @transform_2, window_bounds = array<i64: 1, 1, 8, 32>}, {transform_indices = @transform_3, window_bounds = array<i64: 8, 8>}, {transform_indices = @transform_4, window_bounds = array<i64: 1, 1, 8, 32>}]} {
    %c0 = arith.constant 0 : index
    %c0_0 = arith.constant 0 : index
    %c0_1 = arith.constant 0 : index
    %c0_2 = arith.constant 0 : index
    %0 = vector.load %arg3[%c0, %c0_0, %c0_1, %c0_2] : memref<1x1x8x32xbf16, #tpu.memory_space<vmem>>, vector<1x1x8x32xbf16>
    %1 = vector.shape_cast %0 : vector<1x1x8x32xbf16> to vector<8x32xbf16>
    %c0_3 = arith.constant 0 : index
    %c0_4 = arith.constant 0 : index
    %c0_5 = arith.constant 0 : index
    %c0_6 = arith.constant 0 : index
    %2 = vector.load %arg4[%c0_3, %c0_4, %c0_5, %c0_6] : memref<1x1x8x32xbf16, #tpu.memory_space<vmem>>, vector<1x1x8x32xbf16>
    %3 = vector.shape_cast %2 : vector<1x1x8x32xbf16> to vector<8x32xbf16>
    %c0_7 = arith.constant 0 : index
    %c0_8 = arith.constant 0 : index
    %c0_9 = arith.constant 0 : index
    %c0_10 = arith.constant 0 : index
    %4 = vector.load %arg5[%c0_7, %c0_8, %c0_9, %c0_10] : memref<1x1x8x32xbf16, #tpu.memory_space<vmem>>, vector<1x1x8x32xbf16>
    %5 = vector.shape_cast %4 : vector<1x1x8x32xbf16> to vector<8x32xbf16>
    %cst = arith.constant dense<0.000000e+00> : vector<8x8xf32>
    %6 = tpu.matmul %1, %3, %cst {dimension_numbers = #tpu.dot_dimension_numbers<[1], [1], [0], [0], [0, 0, 1, 0], [], []>} : vector<8x32xbf16>, vector<8x32xbf16>, vector<8x8xf32> -> vector<8x8xf32>
    %c0_11 = arith.constant 0 : index
    %c0_12 = arith.constant 0 : index
    %7 = vector.load %arg6[%c0_11, %c0_12] : memref<8x8xf32, #tpu.memory_space<vmem>>, vector<8x8xf32>
    %8 = arith.addf %6, %7 : vector<8x8xf32>
    %cst_13 = arith.constant dense<0xFF800000> : vector<8xf32>
    %9 = vector.multi_reduction <maximumf>, %8, %cst_13 [1] : vector<8x8xf32> to vector<8xf32>
    %10 = vector.shape_cast %9 : vector<8xf32> to vector<8x1xf32>
    %11 = vector.broadcast %10 : vector<8x1xf32> to vector<8x8xf32>
    %12 = arith.subf %8, %11 : vector<8x8xf32>
    %13 = math.exp %12 : vector<8x8xf32>
    %cst_14 = arith.constant dense<0.000000e+00> : vector<8xf32>
    %14 = vector.multi_reduction <add>, %13, %cst_14 [1] : vector<8x8xf32> to vector<8xf32>
    %15 = vector.shape_cast %14 : vector<8xf32> to vector<8x1xf32>
    %16 = tpu.reciprocal %15 {approx = true} : vector<8x1xf32> -> vector<8x1xf32>
    %17 = vector.broadcast %16 : vector<8x1xf32> to vector<8x8xf32>
    %18 = arith.mulf %13, %17 : vector<8x8xf32>
    %19 = arith.truncf %18 : vector<8x8xf32> to vector<8x8xbf16>
    %cst_15 = arith.constant dense<0.000000e+00> : vector<8x32xf32>
    %20 = tpu.matmul %19, %5, %cst_15 {dimension_numbers = #tpu.dot_dimension_numbers<[1], [0], [0], [1], [0, 0, 1, 1], [], []>} : vector<8x8xbf16>, vector<8x32xbf16>, vector<8x32xf32> -> vector<8x32xf32>
    %21 = arith.truncf %20 : vector<8x32xf32> to vector<8x32xbf16>
    %c0_16 = arith.constant 0 : index
    %c0_17 = arith.constant 0 : index
    %c0_18 = arith.constant 0 : index
    %c0_19 = arith.constant 0 : index
    %22 = vector.load %arg7[%c0_16, %c0_17, %c0_18, %c0_19] : memref<1x1x8x32xbf16, #tpu.memory_space<vmem>>, vector<1x1x8x32xbf16>
    %23 = vector.shape_cast %22 : vector<1x1x8x32xbf16> to vector<8x32xbf16>
    %24 = vector.shape_cast %21 : vector<8x32xbf16> to vector<1x1x8x32xbf16>
    tpu.vector_store %arg7[%c0_16, %c0_17, %c0_18, %c0_19], %24 {strides = array<i32>} : memref<1x1x8x32xbf16, #tpu.memory_space<vmem>>, vector<1x1x8x32xbf16>,
    return
  }
  func.func @transform_0(%arg0: i32, %arg1: i32, %arg2: i32) -> (i32, i32, i32, i32) {
    %c0_i32 = arith.constant 0 : i32
    %c0_i32_0 = arith.constant 0 : i32
    return %arg0, %arg1, %arg2, %c0_i32 : i32, i32, i32, i32
  }
  func.func @transform_1(%arg0: i32, %arg1: i32, %arg2: i32) -> (i32, i32, i32, i32) {
    %c0_i32 = arith.constant 0 : i32
    %c0_i32_0 = arith.constant 0 : i32
    %c0_i32_1 = arith.constant 0 : i32
    return %arg0, %arg1, %c0_i32, %c0_i32_0 : i32, i32, i32, i32
  }
  func.func @transform_2(%arg0: i32, %arg1: i32, %arg2: i32) -> (i32, i32, i32, i32) {
    %c0_i32 = arith.constant 0 : i32
    %c0_i32_0 = arith.constant 0 : i32
    %c0_i32_1 = arith.constant 0 : i32
    return %arg0, %arg1, %c0_i32, %c0_i32_0 : i32, i32, i32, i32
  }
  func.func @transform_3(%arg0: i32, %arg1: i32, %arg2: i32) -> (i32, i32) {
    %c0_i32 = arith.constant 0 : i32
    %c0_i32_0 = arith.constant 0 : i32
    return %arg2, %c0_i32 : i32, i32
  }
  func.func @transform_4(%arg0: i32, %arg1: i32, %arg2: i32) -> (i32, i32, i32, i32) {
    %c0_i32 = arith.constant 0 : i32
    %c0_i32_0 = arith.constant 0 : i32
    return %arg0, %arg1, %arg2, %c0_i32 : i32, i32, i32, i32
  }
}

module attributes {stable_mosaic.version = 11 : i64} {
  func.func @_matmul_ln_kernel(%arg0: i32, %arg1: i32, %arg2: memref<16x128xbf16, #tpu.memory_space<vmem>>, %arg3: memref<128x128xbf16, #tpu.memory_space<vmem>>, %arg4: memref<1x128xf32, #tpu.memory_space<vmem>>, %arg5: memref<16x128xbf16, #tpu.memory_space<vmem>>, %arg6: memref<1x128xf32, #tpu.memory_space<vmem>>, %arg7: memref<1x128xf32, #tpu.memory_space<vmem>>, %arg8: memref<16x128xbf16, #tpu.memory_space<vmem>>, %arg9: memref<16x128xf32, #tpu.memory_space<vmem>>) attributes {dimension_semantics = [#tpu.dimension_semantics<parallel>, #tpu.dimension_semantics<arbitrary>], iteration_bounds = array<i64: 1, 1>, scalar_prefetch = 0 : i64, scratch_operands = 1 : i64, tpu.core_type = #tpu.core_type<tc>, window_params = [{transform_indices = @transform_0, window_bounds = array<i64: 16, 128>}, {transform_indices = @transform_1, window_bounds = array<i64: 128, 128>}, {pipeline_mode = #tpu.pipeline_mode<synchronous>, transform_indices = @transform_2, window_bounds = array<i64: 1, 128>}, {transform_indices = @transform_3, window_bounds = array<i64: 16, 128>}, {pipeline_mode = #tpu.pipeline_mode<synchronous>, transform_indices = @transform_4, window_bounds = array<i64: 1, 128>}, {pipeline_mode = #tpu.pipeline_mode<synchronous>, transform_indices = @transform_5, window_bounds = array<i64: 1, 128>}, {transform_indices = @transform_6, window_bounds = array<i64: 16, 128>}]} {
    %c0_i32 = arith.constant 0 : i32
    %0 = arith.cmpi eq, %arg1, %c0_i32 : i32
    %1 = arith.extui %0 : i1 to i32
    %c0_i32_0 = arith.constant 0 : i32
    %2 = arith.cmpi ne, %1, %c0_i32_0 : i32
    scf.if %2 {
      %cst_10 = arith.constant 0.000000e+00 : f32
      %12 = vector.broadcast %cst_10 : f32 to vector<16x128xf32>
      %c0_11 = arith.constant 0 : index
      %c0_12 = arith.constant 0 : index
      %13 = vector.load %arg9[%c0_11, %c0_12] : memref<16x128xf32, #tpu.memory_space<vmem>>, vector<16x128xf32>
      tpu.vector_store %arg9[%c0_11, %c0_12], %12 {strides = array<i32>} : memref<16x128xf32, #tpu.memory_space<vmem>>, vector<16x128xf32>,
    } else {
    }
    %c0 = arith.constant 0 : index
    %c0_1 = arith.constant 0 : index
    %3 = vector.load %arg9[%c0, %c0_1] : memref<16x128xf32, #tpu.memory_space<vmem>>, vector<16x128xf32>
    %c0_2 = arith.constant 0 : index
    %c0_3 = arith.constant 0 : index
    %4 = vector.load %arg2[%c0_2, %c0_3] : memref<16x128xbf16, #tpu.memory_space<vmem>>, vector<16x128xbf16>
    %c0_4 = arith.constant 0 : index
    %c0_5 = arith.constant 0 : index
    %5 = vector.load %arg3[%c0_4, %c0_5] : memref<128x128xbf16, #tpu.memory_space<vmem>>, vector<128x128xbf16>
    %cst = arith.constant dense<0.000000e+00> : vector<16x128xf32>
    %6 = tpu.matmul %4, %5, %cst {dimension_numbers = #tpu.dot_dimension_numbers<[1], [0], [0], [1], [0, 0, 1, 1], [], []>} : vector<16x128xbf16>, vector<128x128xbf16>, vector<16x128xf32> -> vector<16x128xf32>
    %7 = arith.addf %3, %6 : vector<16x128xf32>
    %c0_6 = arith.constant 0 : index
    %c0_7 = arith.constant 0 : index
    %8 = vector.load %arg9[%c0_6, %c0_7] : memref<16x128xf32, #tpu.memory_space<vmem>>, vector<16x128xf32>
    tpu.vector_store %arg9[%c0_6, %c0_7], %7 {strides = array<i32>} : memref<16x128xf32, #tpu.memory_space<vmem>>, vector<16x128xf32>,
    %c0_i32_8 = arith.constant 0 : i32
    %9 = arith.cmpi eq, %arg1, %c0_i32_8 : i32
    %10 = arith.extui %9 : i1 to i32
    %c0_i32_9 = arith.constant 0 : i32
    %11 = arith.cmpi ne, %10, %c0_i32_9 : i32
    scf.if %11 {
      %c0_10 = arith.constant 0 : index
      %c0_11 = arith.constant 0 : index
      %12 = vector.load %arg9[%c0_10, %c0_11] : memref<16x128xf32, #tpu.memory_space<vmem>>, vector<16x128xf32>
      %c0_12 = arith.constant 0 : index
      %c0_13 = arith.constant 0 : index
      %13 = vector.load %arg4[%c0_12, %c0_13] : memref<1x128xf32, #tpu.memory_space<vmem>>, vector<1x128xf32>
      %14 = vector.broadcast %13 : vector<1x128xf32> to vector<16x128xf32>
      %15 = arith.addf %12, %14 : vector<16x128xf32>
      %c0_14 = arith.constant 0 : index
      %c0_15 = arith.constant 0 : index
      %16 = vector.load %arg5[%c0_14, %c0_15] : memref<16x128xbf16, #tpu.memory_space<vmem>>, vector<16x128xbf16>
      %17 = arith.extf %16 : vector<16x128xbf16> to vector<16x128xf32>
      %18 = arith.addf %15, %17 : vector<16x128xf32>
      %cst_16 = arith.constant dense<0.000000e+00> : vector<16xf32>
      %19 = vector.multi_reduction <add>, %18, %cst_16 [1] : vector<16x128xf32> to vector<16xf32>
      %20 = vector.shape_cast %19 : vector<16xf32> to vector<16x1xf32>
      %cst_17 = arith.constant 1.280000e+02 : f32
      %21 = vector.broadcast %cst_17 : f32 to vector<16x1xf32>
      %22 = arith.divf %20, %21 : vector<16x1xf32>
      %23 = vector.broadcast %22 : vector<16x1xf32> to vector<16x128xf32>
      %24 = arith.subf %18, %23 : vector<16x128xf32>
      %25 = arith.mulf %24, %24 : vector<16x128xf32>
      %cst_18 = arith.constant dense<0.000000e+00> : vector<16xf32>
      %26 = vector.multi_reduction <add>, %25, %cst_18 [1] : vector<16x128xf32> to vector<16xf32>
      %27 = vector.shape_cast %26 : vector<16xf32> to vector<16x1xf32>
      %cst_19 = arith.constant 1.280000e+02 : f32
      %28 = vector.broadcast %cst_19 : f32 to vector<16x1xf32>
      %29 = arith.divf %27, %28 : vector<16x1xf32>
      %30 = vector.broadcast %22 : vector<16x1xf32> to vector<16x128xf32>
      %31 = arith.subf %18, %30 : vector<16x128xf32>
      %cst_20 = arith.constant 9.99999974E-6 : f32
      %32 = vector.broadcast %cst_20 : f32 to vector<16x1xf32>
      %33 = arith.addf %29, %32 : vector<16x1xf32>
      %34 = math.rsqrt %33 : vector<16x1xf32>
      %35 = vector.broadcast %34 : vector<16x1xf32> to vector<16x128xf32>
      %36 = arith.mulf %31, %35 : vector<16x128xf32>
      %c0_21 = arith.constant 0 : index
      %c0_22 = arith.constant 0 : index
      %37 = vector.load %arg6[%c0_21, %c0_22] : memref<1x128xf32, #tpu.memory_space<vmem>>, vector<1x128xf32>
      %38 = vector.broadcast %37 : vector<1x128xf32> to vector<16x128xf32>
      %39 = arith.mulf %36, %38 : vector<16x128xf32>
      %c0_23 = arith.constant 0 : index
      %c0_24 = arith.constant 0 : index
      %40 = vector.load %arg7[%c0_23, %c0_24] : memref<1x128xf32, #tpu.memory_space<vmem>>, vector<1x128xf32>
      %41 = vector.broadcast %40 : vector<1x128xf32> to vector<16x128xf32>
      %42 = arith.addf %39, %41 : vector<16x128xf32>
      %43 = arith.truncf %42 : vector<16x128xf32> to vector<16x128xbf16>
      %c0_25 = arith.constant 0 : index
      %c0_26 = arith.constant 0 : index
      %44 = vector.load %arg8[%c0_25, %c0_26] : memref<16x128xbf16, #tpu.memory_space<vmem>>, vector<16x128xbf16>
      tpu.vector_store %arg8[%c0_25, %c0_26], %43 {strides = array<i32>} : memref<16x128xbf16, #tpu.memory_space<vmem>>, vector<16x128xbf16>,
    } else {
    }
    return
  }
  func.func @transform_0(%arg0: i32, %arg1: i32) -> (i32, i32) {
    %c0_i32 = arith.constant 0 : i32
    return %arg0, %arg1 : i32, i32
  }
  func.func @transform_1(%arg0: i32, %arg1: i32) -> (i32, i32) {
    %c0_i32 = arith.constant 0 : i32
    %c0_i32_0 = arith.constant 0 : i32
    return %arg1, %c0_i32 : i32, i32
  }
  func.func @transform_2(%arg0: i32, %arg1: i32) -> (i32, i32) {
    %c0_i32 = arith.constant 0 : i32
    %c0_i32_0 = arith.constant 0 : i32
    %c0_i32_1 = arith.constant 0 : i32
    return %c0_i32, %c0_i32_0 : i32, i32
  }
  func.func @transform_3(%arg0: i32, %arg1: i32) -> (i32, i32) {
    %c0_i32 = arith.constant 0 : i32
    %c0_i32_0 = arith.constant 0 : i32
    return %arg0, %c0_i32 : i32, i32
  }
  func.func @transform_4(%arg0: i32, %arg1: i32) -> (i32, i32) {
    %c0_i32 = arith.constant 0 : i32
    %c0_i32_0 = arith.constant 0 : i32
    %c0_i32_1 = arith.constant 0 : i32
    return %c0_i32, %c0_i32_0 : i32, i32
  }
  func.func @transform_5(%arg0: i32, %arg1: i32) -> (i32, i32) {
    %c0_i32 = arith.constant 0 : i32
    %c0_i32_0 = arith.constant 0 : i32
    %c0_i32_1 = arith.constant 0 : i32
    return %c0_i32, %c0_i32_0 : i32, i32
  }
  func.func @transform_6(%arg0: i32, %arg1: i32) -> (i32, i32) {
    %c0_i32 = arith.constant 0 : i32
    %c0_i32_0 = arith.constant 0 : i32
    return %arg0, %c0_i32 : i32, i32
  }
}

module attributes {stable_mosaic.version = 11 : i64} {
  func.func @_matmul_kernel(%arg0: i32, %arg1: i32, %arg2: i32, %arg3: memref<16x128xbf16, #tpu.memory_space<vmem>>, %arg4: memref<128x256xbf16, #tpu.memory_space<vmem>>, %arg5: memref<1x256xf32, #tpu.memory_space<vmem>>, %arg6: memref<16x256xbf16, #tpu.memory_space<vmem>>, %arg7: memref<16x256xf32, #tpu.memory_space<vmem>>) attributes {dimension_semantics = [#tpu.dimension_semantics<parallel>, #tpu.dimension_semantics<parallel>, #tpu.dimension_semantics<arbitrary>], iteration_bounds = array<i64: 1, 1, 1>, scalar_prefetch = 0 : i64, scratch_operands = 1 : i64, tpu.core_type = #tpu.core_type<tc>, window_params = [{transform_indices = @transform_0, window_bounds = array<i64: 16, 128>}, {transform_indices = @transform_1, window_bounds = array<i64: 128, 256>}, {transform_indices = @transform_2, window_bounds = array<i64: 1, 256>}, {transform_indices = @transform_3, window_bounds = array<i64: 16, 256>}]} {
    %c0_i32 = arith.constant 0 : i32
    %0 = arith.cmpi eq, %arg2, %c0_i32 : i32
    %1 = arith.extui %0 : i1 to i32
    %c0_i32_0 = arith.constant 0 : i32
    %2 = arith.cmpi ne, %1, %c0_i32_0 : i32
    scf.if %2 {
      %cst_10 = arith.constant 0.000000e+00 : f32
      %12 = vector.broadcast %cst_10 : f32 to vector<16x256xf32>
      %c0_11 = arith.constant 0 : index
      %c0_12 = arith.constant 0 : index
      %13 = vector.load %arg7[%c0_11, %c0_12] : memref<16x256xf32, #tpu.memory_space<vmem>>, vector<16x256xf32>
      tpu.vector_store %arg7[%c0_11, %c0_12], %12 {strides = array<i32>} : memref<16x256xf32, #tpu.memory_space<vmem>>, vector<16x256xf32>,
    } else {
    }
    %c0 = arith.constant 0 : index
    %c0_1 = arith.constant 0 : index
    %3 = vector.load %arg7[%c0, %c0_1] : memref<16x256xf32, #tpu.memory_space<vmem>>, vector<16x256xf32>
    %c0_2 = arith.constant 0 : index
    %c0_3 = arith.constant 0 : index
    %4 = vector.load %arg3[%c0_2, %c0_3] : memref<16x128xbf16, #tpu.memory_space<vmem>>, vector<16x128xbf16>
    %c0_4 = arith.constant 0 : index
    %c0_5 = arith.constant 0 : index
    %5 = vector.load %arg4[%c0_4, %c0_5] : memref<128x256xbf16, #tpu.memory_space<vmem>>, vector<128x256xbf16>
    %cst = arith.constant dense<0.000000e+00> : vector<16x256xf32>
    %6 = tpu.matmul %4, %5, %cst {dimension_numbers = #tpu.dot_dimension_numbers<[1], [0], [0], [1], [0, 0, 1, 1], [], []>} : vector<16x128xbf16>, vector<128x256xbf16>, vector<16x256xf32> -> vector<16x256xf32>
    %7 = arith.addf %3, %6 : vector<16x256xf32>
    %c0_6 = arith.constant 0 : index
    %c0_7 = arith.constant 0 : index
    %8 = vector.load %arg7[%c0_6, %c0_7] : memref<16x256xf32, #tpu.memory_space<vmem>>, vector<16x256xf32>
    tpu.vector_store %arg7[%c0_6, %c0_7], %7 {strides = array<i32>} : memref<16x256xf32, #tpu.memory_space<vmem>>, vector<16x256xf32>,
    %c0_i32_8 = arith.constant 0 : i32
    %9 = arith.cmpi eq, %arg2, %c0_i32_8 : i32
    %10 = arith.extui %9 : i1 to i32
    %c0_i32_9 = arith.constant 0 : i32
    %11 = arith.cmpi ne, %10, %c0_i32_9 : i32
    scf.if %11 {
      %c0_10 = arith.constant 0 : index
      %c0_11 = arith.constant 0 : index
      %12 = vector.load %arg7[%c0_10, %c0_11] : memref<16x256xf32, #tpu.memory_space<vmem>>, vector<16x256xf32>
      %c0_12 = arith.constant 0 : index
      %c0_13 = arith.constant 0 : index
      %13 = vector.load %arg5[%c0_12, %c0_13] : memref<1x256xf32, #tpu.memory_space<vmem>>, vector<1x256xf32>
      %14 = vector.broadcast %13 : vector<1x256xf32> to vector<16x256xf32>
      %15 = arith.addf %12, %14 : vector<16x256xf32>
      %cst_14 = arith.constant 0.000000e+00 : f32
      %16 = vector.broadcast %cst_14 : f32 to vector<16x256xf32>
      %17 = arith.maximumf %15, %16 : vector<16x256xf32>
      %18 = arith.truncf %17 : vector<16x256xf32> to vector<16x256xbf16>
      %c0_15 = arith.constant 0 : index
      %c0_16 = arith.constant 0 : index
      %19 = vector.load %arg6[%c0_15, %c0_16] : memref<16x256xbf16, #tpu.memory_space<vmem>>, vector<16x256xbf16>
      tpu.vector_store %arg6[%c0_15, %c0_16], %18 {strides = array<i32>} : memref<16x256xbf16, #tpu.memory_space<vmem>>, vector<16x256xbf16>,
    } else {
    }
    return
  }
  func.func @transform_0(%arg0: i32, %arg1: i32, %arg2: i32) -> (i32, i32) {
    %c0_i32 = arith.constant 0 : i32
    return %arg0, %arg2 : i32, i32
  }
  func.func @transform_1(%arg0: i32, %arg1: i32, %arg2: i32) -> (i32, i32) {
    %c0_i32 = arith.constant 0 : i32
    return %arg2, %arg1 : i32, i32
  }
  func.func @transform_2(%arg0: i32, %arg1: i32, %arg2: i32) -> (i32, i32) {
    %c0_i32 = arith.constant 0 : i32
    %c0_i32_0 = arith.constant 0 : i32
    return %c0_i32, %arg1 : i32, i32
  }
  func.func @transform_3(%arg0: i32, %arg1: i32, %arg2: i32) -> (i32, i32) {
    %c0_i32 = arith.constant 0 : i32
    return %arg0, %arg1 : i32, i32
  }
}

module attributes {stable_mosaic.version = 11 : i64} {
  func.func @_matmul_kernel(%arg0: i32, %arg1: i32, %arg2: i32, %arg3: memref<16x128xbf16, #tpu.memory_space<vmem>>, %arg4: memref<128x256xbf16, #tpu.memory_space<vmem>>, %arg5: memref<1x256xf32, #tpu.memory_space<vmem>>, %arg6: memref<16x256xbf16, #tpu.memory_space<vmem>>, %arg7: memref<16x256xf32, #tpu.memory_space<vmem>>) attributes {dimension_semantics = [#tpu.dimension_semantics<parallel>, #tpu.dimension_semantics<parallel>, #tpu.dimension_semantics<arbitrary>], iteration_bounds = array<i64: 1, 1, 1>, scalar_prefetch = 0 : i64, scratch_operands = 1 : i64, tpu.core_type = #tpu.core_type<tc>, window_params = [{transform_indices = @transform_0, window_bounds = array<i64: 16, 128>}, {transform_indices = @transform_1, window_bounds = array<i64: 128, 256>}, {transform_indices = @transform_2, window_bounds = array<i64: 1, 256>}, {transform_indices = @transform_3, window_bounds = array<i64: 16, 256>}]} {
    %c0_i32 = arith.constant 0 : i32
    %0 = arith.cmpi eq, %arg2, %c0_i32 : i32
    %1 = arith.extui %0 : i1 to i32
    %c0_i32_0 = arith.constant 0 : i32
    %2 = arith.cmpi ne, %1, %c0_i32_0 : i32
    scf.if %2 {
      %cst_10 = arith.constant 0.000000e+00 : f32
      %12 = vector.broadcast %cst_10 : f32 to vector<16x256xf32>
      %c0_11 = arith.constant 0 : index
      %c0_12 = arith.constant 0 : index
      %13 = vector.load %arg7[%c0_11, %c0_12] : memref<16x256xf32, #tpu.memory_space<vmem>>, vector<16x256xf32>
      tpu.vector_store %arg7[%c0_11, %c0_12], %12 {strides = array<i32>} : memref<16x256xf32, #tpu.memory_space<vmem>>, vector<16x256xf32>,
    } else {
    }
    %c0 = arith.constant 0 : index
    %c0_1 = arith.constant 0 : index
    %3 = vector.load %arg7[%c0, %c0_1] : memref<16x256xf32, #tpu.memory_space<vmem>>, vector<16x256xf32>
    %c0_2 = arith.constant 0 : index
    %c0_3 = arith.constant 0 : index
    %4 = vector.load %arg3[%c0_2, %c0_3] : memref<16x128xbf16, #tpu.memory_space<vmem>>, vector<16x128xbf16>
    %c0_4 = arith.constant 0 : index
    %c0_5 = arith.constant 0 : index
    %5 = vector.load %arg4[%c0_4, %c0_5] : memref<128x256xbf16, #tpu.memory_space<vmem>>, vector<128x256xbf16>
    %cst = arith.constant dense<0.000000e+00> : vector<16x256xf32>
    %6 = tpu.matmul %4, %5, %cst {dimension_numbers = #tpu.dot_dimension_numbers<[1], [0], [0], [1], [0, 0, 1, 1], [], []>} : vector<16x128xbf16>, vector<128x256xbf16>, vector<16x256xf32> -> vector<16x256xf32>
    %7 = arith.addf %3, %6 : vector<16x256xf32>
    %c0_6 = arith.constant 0 : index
    %c0_7 = arith.constant 0 : index
    %8 = vector.load %arg7[%c0_6, %c0_7] : memref<16x256xf32, #tpu.memory_space<vmem>>, vector<16x256xf32>
    tpu.vector_store %arg7[%c0_6, %c0_7], %7 {strides = array<i32>} : memref<16x256xf32, #tpu.memory_space<vmem>>, vector<16x256xf32>,
    %c0_i32_8 = arith.constant 0 : i32
    %9 = arith.cmpi eq, %arg2, %c0_i32_8 : i32
    %10 = arith.extui %9 : i1 to i32
    %c0_i32_9 = arith.constant 0 : i32
    %11 = arith.cmpi ne, %10, %c0_i32_9 : i32
    scf.if %11 {
      %c0_10 = arith.constant 0 : index
      %c0_11 = arith.constant 0 : index
      %12 = vector.load %arg7[%c0_10, %c0_11] : memref<16x256xf32, #tpu.memory_space<vmem>>, vector<16x256xf32>
      %c0_12 = arith.constant 0 : index
      %c0_13 = arith.constant 0 : index
      %13 = vector.load %arg5[%c0_12, %c0_13] : memref<1x256xf32, #tpu.memory_space<vmem>>, vector<1x256xf32>
      %14 = vector.broadcast %13 : vector<1x256xf32> to vector<16x256xf32>
      %15 = arith.addf %12, %14 : vector<16x256xf32>
      %16 = arith.truncf %15 : vector<16x256xf32> to vector<16x256xbf16>
      %c0_14 = arith.constant 0 : index
      %c0_15 = arith.constant 0 : index
      %17 = vector.load %arg6[%c0_14, %c0_15] : memref<16x256xbf16, #tpu.memory_space<vmem>>, vector<16x256xbf16>
      tpu.vector_store %arg6[%c0_14, %c0_15], %16 {strides = array<i32>} : memref<16x256xbf16, #tpu.memory_space<vmem>>, vector<16x256xbf16>,
    } else {
    }
    return
  }
  func.func @transform_0(%arg0: i32, %arg1: i32, %arg2: i32) -> (i32, i32) {
    %c0_i32 = arith.constant 0 : i32
    return %arg0, %arg2 : i32, i32
  }
  func.func @transform_1(%arg0: i32, %arg1: i32, %arg2: i32) -> (i32, i32) {
    %c0_i32 = arith.constant 0 : i32
    return %arg2, %arg1 : i32, i32
  }
  func.func @transform_2(%arg0: i32, %arg1: i32, %arg2: i32) -> (i32, i32) {
    %c0_i32 = arith.constant 0 : i32
    %c0_i32_0 = arith.constant 0 : i32
    return %c0_i32, %arg1 : i32, i32
  }
  func.func @transform_3(%arg0: i32, %arg1: i32, %arg2: i32) -> (i32, i32) {
    %c0_i32 = arith.constant 0 : i32
    return %arg0, %arg1 : i32, i32
  }
}

module attributes {stable_mosaic.version = 11 : i64} {
  func.func @_matmul_ln_kernel(%arg0: i32, %arg1: i32, %arg2: memref<16x256xbf16, #tpu.memory_space<vmem>>, %arg3: memref<256x128xbf16, #tpu.memory_space<vmem>>, %arg4: memref<1x128xf32, #tpu.memory_space<vmem>>, %arg5: memref<16x128xbf16, #tpu.memory_space<vmem>>, %arg6: memref<1x128xf32, #tpu.memory_space<vmem>>, %arg7: memref<1x128xf32, #tpu.memory_space<vmem>>, %arg8: memref<16x128xbf16, #tpu.memory_space<vmem>>, %arg9: memref<16x128xf32, #tpu.memory_space<vmem>>) attributes {dimension_semantics = [#tpu.dimension_semantics<parallel>, #tpu.dimension_semantics<arbitrary>], iteration_bounds = array<i64: 1, 1>, scalar_prefetch = 0 : i64, scratch_operands = 1 : i64, tpu.core_type = #tpu.core_type<tc>, window_params = [{transform_indices = @transform_0, window_bounds = array<i64: 16, 256>}, {transform_indices = @transform_1, window_bounds = array<i64: 256, 128>}, {pipeline_mode = #tpu.pipeline_mode<synchronous>, transform_indices = @transform_2, window_bounds = array<i64: 1, 128>}, {transform_indices = @transform_3, window_bounds = array<i64: 16, 128>}, {pipeline_mode = #tpu.pipeline_mode<synchronous>, transform_indices = @transform_4, window_bounds = array<i64: 1, 128>}, {pipeline_mode = #tpu.pipeline_mode<synchronous>, transform_indices = @transform_5, window_bounds = array<i64: 1, 128>}, {transform_indices = @transform_6, window_bounds = array<i64: 16, 128>}]} {
    %c0_i32 = arith.constant 0 : i32
    %0 = arith.cmpi eq, %arg1, %c0_i32 : i32
    %1 = arith.extui %0 : i1 to i32
    %c0_i32_0 = arith.constant 0 : i32
    %2 = arith.cmpi ne, %1, %c0_i32_0 : i32
    scf.if %2 {
      %cst_10 = arith.constant 0.000000e+00 : f32
      %12 = vector.broadcast %cst_10 : f32 to vector<16x128xf32>
      %c0_11 = arith.constant 0 : index
      %c0_12 = arith.constant 0 : index
      %13 = vector.load %arg9[%c0_11, %c0_12] : memref<16x128xf32, #tpu.memory_space<vmem>>, vector<16x128xf32>
      tpu.vector_store %arg9[%c0_11, %c0_12], %12 {strides = array<i32>} : memref<16x128xf32, #tpu.memory_space<vmem>>, vector<16x128xf32>,
    } else {
    }
    %c0 = arith.constant 0 : index
    %c0_1 = arith.constant 0 : index
    %3 = vector.load %arg9[%c0, %c0_1] : memref<16x128xf32, #tpu.memory_space<vmem>>, vector<16x128xf32>
    %c0_2 = arith.constant 0 : index
    %c0_3 = arith.constant 0 : index
    %4 = vector.load %arg2[%c0_2, %c0_3] : memref<16x256xbf16, #tpu.memory_space<vmem>>, vector<16x256xbf16>
    %c0_4 = arith.constant 0 : index
    %c0_5 = arith.constant 0 : index
    %5 = vector.load %arg3[%c0_4, %c0_5] : memref<256x128xbf16, #tpu.memory_space<vmem>>, vector<256x128xbf16>
    %cst = arith.constant dense<0.000000e+00> : vector<16x128xf32>
    %6 = tpu.matmul %4, %5, %cst {dimension_numbers = #tpu.dot_dimension_numbers<[1], [0], [0], [1], [0, 0, 1, 1], [], []>} : vector<16x256xbf16>, vector<256x128xbf16>, vector<16x128xf32> -> vector<16x128xf32>
    %7 = arith.addf %3, %6 : vector<16x128xf32>
    %c0_6 = arith.constant 0 : index
    %c0_7 = arith.constant 0 : index
    %8 = vector.load %arg9[%c0_6, %c0_7] : memref<16x128xf32, #tpu.memory_space<vmem>>, vector<16x128xf32>
    tpu.vector_store %arg9[%c0_6, %c0_7], %7 {strides = array<i32>} : memref<16x128xf32, #tpu.memory_space<vmem>>, vector<16x128xf32>,
    %c0_i32_8 = arith.constant 0 : i32
    %9 = arith.cmpi eq, %arg1, %c0_i32_8 : i32
    %10 = arith.extui %9 : i1 to i32
    %c0_i32_9 = arith.constant 0 : i32
    %11 = arith.cmpi ne, %10, %c0_i32_9 : i32
    scf.if %11 {
      %c0_10 = arith.constant 0 : index
      %c0_11 = arith.constant 0 : index
      %12 = vector.load %arg9[%c0_10, %c0_11] : memref<16x128xf32, #tpu.memory_space<vmem>>, vector<16x128xf32>
      %c0_12 = arith.constant 0 : index
      %c0_13 = arith.constant 0 : index
      %13 = vector.load %arg4[%c0_12, %c0_13] : memref<1x128xf32, #tpu.memory_space<vmem>>, vector<1x128xf32>
      %14 = vector.broadcast %13 : vector<1x128xf32> to vector<16x128xf32>
      %15 = arith.addf %12, %14 : vector<16x128xf32>
      %c0_14 = arith.constant 0 : index
      %c0_15 = arith.constant 0 : index
      %16 = vector.load %arg5[%c0_14, %c0_15] : memref<16x128xbf16, #tpu.memory_space<vmem>>, vector<16x128xbf16>
      %17 = arith.extf %16 : vector<16x128xbf16> to vector<16x128xf32>
      %18 = arith.addf %15, %17 : vector<16x128xf32>
      %cst_16 = arith.constant dense<0.000000e+00> : vector<16xf32>
      %19 = vector.multi_reduction <add>, %18, %cst_16 [1] : vector<16x128xf32> to vector<16xf32>
      %20 = vector.shape_cast %19 : vector<16xf32> to vector<16x1xf32>
      %cst_17 = arith.constant 1.280000e+02 : f32
      %21 = vector.broadcast %cst_17 : f32 to vector<16x1xf32>
      %22 = arith.divf %20, %21 : vector<16x1xf32>
      %23 = vector.broadcast %22 : vector<16x1xf32> to vector<16x128xf32>
      %24 = arith.subf %18, %23 : vector<16x128xf32>
      %25 = arith.mulf %24, %24 : vector<16x128xf32>
      %cst_18 = arith.constant dense<0.000000e+00> : vector<16xf32>
      %26 = vector.multi_reduction <add>, %25, %cst_18 [1] : vector<16x128xf32> to vector<16xf32>
      %27 = vector.shape_cast %26 : vector<16xf32> to vector<16x1xf32>
      %cst_19 = arith.constant 1.280000e+02 : f32
      %28 = vector.broadcast %cst_19 : f32 to vector<16x1xf32>
      %29 = arith.divf %27, %28 : vector<16x1xf32>
      %30 = vector.broadcast %22 : vector<16x1xf32> to vector<16x128xf32>
      %31 = arith.subf %18, %30 : vector<16x128xf32>
      %cst_20 = arith.constant 9.99999974E-6 : f32
      %32 = vector.broadcast %cst_20 : f32 to vector<16x1xf32>
      %33 = arith.addf %29, %32 : vector<16x1xf32>
      %34 = math.rsqrt %33 : vector<16x1xf32>
      %35 = vector.broadcast %34 : vector<16x1xf32> to vector<16x128xf32>
      %36 = arith.mulf %31, %35 : vector<16x128xf32>
      %c0_21 = arith.constant 0 : index
      %c0_22 = arith.constant 0 : index
      %37 = vector.load %arg6[%c0_21, %c0_22] : memref<1x128xf32, #tpu.memory_space<vmem>>, vector<1x128xf32>
      %38 = vector.broadcast %37 : vector<1x128xf32> to vector<16x128xf32>
      %39 = arith.mulf %36, %38 : vector<16x128xf32>
      %c0_23 = arith.constant 0 : index
      %c0_24 = arith.constant 0 : index
      %40 = vector.load %arg7[%c0_23, %c0_24] : memref<1x128xf32, #tpu.memory_space<vmem>>, vector<1x128xf32>
      %41 = vector.broadcast %40 : vector<1x128xf32> to vector<16x128xf32>
      %42 = arith.addf %39, %41 : vector<16x128xf32>
      %43 = arith.truncf %42 : vector<16x128xf32> to vector<16x128xbf16>
      %c0_25 = arith.constant 0 : index
      %c0_26 = arith.constant 0 : index
      %44 = vector.load %arg8[%c0_25, %c0_26] : memref<16x128xbf16, #tpu.memory_space<vmem>>, vector<16x128xbf16>
      tpu.vector_store %arg8[%c0_25, %c0_26], %43 {strides = array<i32>} : memref<16x128xbf16, #tpu.memory_space<vmem>>, vector<16x128xbf16>,
    } else {
    }
    return
  }
  func.func @transform_0(%arg0: i32, %arg1: i32) -> (i32, i32) {
    %c0_i32 = arith.constant 0 : i32
    return %arg0, %arg1 : i32, i32
  }
  func.func @transform_1(%arg0: i32, %arg1: i32) -> (i32, i32) {
    %c0_i32 = arith.constant 0 : i32
    %c0_i32_0 = arith.constant 0 : i32
    return %arg1, %c0_i32 : i32, i32
  }
  func.func @transform_2(%arg0: i32, %arg1: i32) -> (i32, i32) {
    %c0_i32 = arith.constant 0 : i32
    %c0_i32_0 = arith.constant 0 : i32
    %c0_i32_1 = arith.constant 0 : i32
    return %c0_i32, %c0_i32_0 : i32, i32
  }
  func.func @transform_3(%arg0: i32, %arg1: i32) -> (i32, i32) {
    %c0_i32 = arith.constant 0 : i32
    %c0_i32_0 = arith.constant 0 : i32
    return %arg0, %c0_i32 : i32, i32
  }
  func.func @transform_4(%arg0: i32, %arg1: i32) -> (i32, i32) {
    %c0_i32 = arith.constant 0 : i32
    %c0_i32_0 = arith.constant 0 : i32
    %c0_i32_1 = arith.constant 0 : i32
    return %c0_i32, %c0_i32_0 : i32, i32
  }
  func.func @transform_5(%arg0: i32, %arg1: i32) -> (i32, i32) {
    %c0_i32 = arith.constant 0 : i32
    %c0_i32_0 = arith.constant 0 : i32
    %c0_i32_1 = arith.constant 0 : i32
    return %c0_i32, %c0_i32_0 : i32, i32
  }
  func.func @transform_6(%arg0: i32, %arg1: i32) -> (i32, i32) {
    %c0_i32 = arith.constant 0 : i32
    %c0_i32_0 = arith.constant 0 : i32
    return %arg0, %c0_i32 : i32, i32
  }
}

</mosaic_0001>

<bundles_post_ra>
// kernel: transformer_generator_forward.12
= control target key start
LH: loop header
LB: loop body
LE: loop exit
PB: predicated region body
PF: predicated region fallthrough
CT: control target
= control target key end

     0   :  { %s750_s15 = smov 0   ;;  %s752_s16 = smov 0   ;;  %s819_s0 = inlined_call_operand.vmem [shape: bf16[2,4,8,32], index: 0, kind: input, shape index: {}]   ;;  %s820_s1 = inlined_call_operand.vmem [shape: bf16[2,4,8,32], index: 1, kind: input, shape index: {}]   ;;  %s821_s2 = inlined_call_operand.vmem [shape: bf16[2,4,8,32], index: 2, kind: input, shape index: {}]   ;;  %s822_s3 = inlined_call_operand.vmem [shape: f32[8,8], index: 3, kind: input, shape index: {}]   ;;  %s823_s4 = inlined_call_operand.vmem [shape: bf16[2,4,8,32], index: 4, kind: output, shape index: {}]  }
   0x1   :  { %s754_s17 = smov 0   ;;  %s756_s18 = smov 0  }
   0x2   :  { %s758_s19 = smov 0  }
   0x3 LB: > { %s29_s20 = sadd.s32 1, %s713_s17  ;;  %s33_s21 = sadd.s32 1, %s717_s18  ;;  %s721_s19 = sphi %s758_s19, %s14_s19   ;;  %s717_s18 = sphi %s756_s18, %s827_s18   ;;  %s713_s17 = sphi %s754_s17, %s826_s17   ;;  %s709_s16 = sphi %s752_s16, %s825_s16   ;;  %s705_s15 = sphi %s750_s15, %s824_s15  }
   0x4   : > { %p31_p0 = scmp.ge.s32.totalorder %s29_s20, 4  ;;  %p608_p1 = scmp.ge.s32.totalorder %s721_s19, 1 }
   0x5   : > { %p234_p2 = scmp.lt.s32.totalorder %s721_s19, 9 }
   0x6   : > { %s829_s20 = smov (%p31_p0, %s29_s20), 0  ;;  %s831_s21 = smov (!%p31_p0, %s33_s21), %s717_s18 }
   0x7   : > { %p235_p3 = pnand %p608_p1, %p234_p2  ;;  %p35_p4 = scmp.ge.s32.totalorder %s831_s21, 2 }
   0x8   : > { %p292_p5 = scmp.lt.s32.totalorder (!%p235_p3), %s709_s16, 1  ;;  %p294_p6 = scmp.lt.s32.totalorder (!%p235_p3), %s705_s15, 3  ;;  %v723_v0 = vmov (!%p235_p3), 0.0   ;;  %vm724_vm0 = vmmov (!%p235_p3), 0   ;;  %vm339_vm1 = vcmask (!%p235_p3), 261120   ;;  %v338_v4 = vld [vmem:[%s822_s3] sm:$0xff] (!%p235_p3) }
   0x9   : > { %s833_s21 = smov (%p35_p4, %s831_s21), 0  ;;  %238 = sbr.rel (%p235_p3) target bundleno = 775 (0x307), region = 36 }
   0xa   : > { %625 = vmatprep.subr.bf16.mxu0 (!%p235_p3), %v723_v0  ;;  %627 = vmatprep.mubr.msk.bf16.mxu0 (!%p235_p3), %vm724_vm0, %v723_v0  ;;  %vm386_vm2 = vcmask (!%p235_p3), 64512   ;;  %vm402_vm3 = vcmask (!%p235_p3), 1043456   ;;  %vm447_vm4 = vcmask (!%p235_p3), 257024  }
   0xb   : > { %631 = vmatprep.subr.bf16.mxu1 (!%p235_p3), %v723_v0  ;;  %633 = vmatprep.mubr.msk.bf16.mxu1 (!%p235_p3), %vm724_vm0, %v723_v0 }
  0x10   : > { %s835_s16 = smov (!%p292_p5, %s709_s16), 1  ;;  %s837_s15 = smov (!%p294_p6, %s705_s15), 3 }
  0x11   : > { %s609_s22 = sshll.u32 %s835_s16, 2 }
  0x12   : > { %s300_s23 = sadd.s32 %s609_s22, %s837_s15 }
  0x13   : > { %s780_s24 = sshll.u32 %s300_s23, 2 }
  0x14   : > { %s310_s27 = scalar_lea.vmem %s820_s1, %s780_s24  ;;  %s302_s30 = scalar_lea.vmem %s819_s0, %s780_s24 }
  0x15   : > { %v336_v1 = vld [vmem:[%s310_s27] sm:$0xf]  ;;  %s318_s9 = scalar_lea.vmem %s821_s2, %s780_s24  ;;  %s333_s12 = scalar_lea.vmem %s823_s4, %s780_s24 }
  0x16   : > { %v344_v2 = vsel %vm339_vm1, %v336_v1, 0  ;;  %v335_v3 = vld [vmem:[%s302_s30] sm:$0xf] }
  0x17   : > { %626 = vmatpush3.bf16.xpose.msra.mxu0 %v344_v2  ;;  %v337_v16 = vld [vmem:[%s318_s9] sm:$0xf] }
  0x18   : > { %v404_v17 = vsel %vm402_vm3, %v337_v16, 0 }
  0x19   : > { %632 = vmatpush3.bf16.msra.mxu1 %v404_v17 }
  0x1e   : > { %628 = vmatmul.mubr.msk.bf16.vlgmr.msra.gmra.mrb[0].mxu0 %vm339_vm1, %v335_v3 }
  0xf1   : > { %v380_v5 = vpop.f32.mrb[0].mxu0 }
  0xf2   : > { %v381_v6 = vadd.f32 %v380_v5, %v338_v4  ;;  %v629_v7 = vpop.f32.mrb[1].mxu0 }
  0xf3   : > { %v383_v8 = vpop.f32.mrb[2].mxu0 }
  0xf4   : > { %v630_v9 = vpop.f32.mrb[3].mxu0  ;;  %v387_v10 = vsel %vm386_vm2, %v381_v6, -inf }
  0xf5   : > { %388 = vmax.xlane.f32.xlu0 %v387_v10 }
 0x182   : > { %v389_v11 = vpop.xlane.xlu0 %388 }
 0x183   : > { %v390_v12 = vsub.f32 %v381_v6, %v389_v11 }
 0x185   : > { %v391_v13 = vmul.f32 1.442695, %v390_v12 }
 0x187   : > { %679 = vpow2.f32 %v391_v13 }
 0x191   : > { %v680_v14 = vpop.eup %679 }
 0x192   : > { %v393_v15 = vsel %vm386_vm2, %v680_v14, 0.0 }
 0x193   : > { %394 = vadd.xlane.f32.xlu0 %v393_v15 }
 0x220   : > { %v395_v18 = vpop.xlane.xlu0 %394 }
 0x221   : > { %681 = vrcp.f32 %v395_v18 }
 0x22b   : > { %v682_v19 = vpop.eup %681 }
 0x22c   : > { %v397_v20 = vmul.f32 %v682_v19, %v680_v14 }
 0x22e   : > { %v398_v21 = vpack.c.bf16 %v397_v20, %v397_v20 }
 0x230   : > { %634 = vmatmul.mubr.msk.bf16.vlgmr.msra.gmra.mrb[0].mxu1 %vm386_vm2, %v398_v21 }
 0x303   : > { %v440_v22 = vpop.f32.mrb[0].mxu1 }
 0x304   : > { %v446_v23 = vpack.c.bf16 %v440_v22, %v440_v22  ;;  %v635_v24 = vpop.f32.mrb[1].mxu1 }
 0x305   : > { %v443_v25 = vpop.f32.mrb[2].mxu1 }
 0x306   : > { %448 = vst.msk [vmem:[%s333_s12] sm:$0xf] %vm447_vm4, %v446_v23  ;;  %v636_v26 = vpop.f32.mrb[3].mxu1 }
 0x307 PF: > { %s14_s19 = sadd.s32 1, %s721_s19   ;;  %s824_s15 = smov %s713_s17 }
 0x308   : > { %p11_p7 = scmp.ge.s32.totalorder %s14_s19, 10   ;;  %s825_s16 = smov %s717_s18 }
 0x309   : > { %s826_s17 = smov %s829_s20  ;;  %s827_s18 = smov %s833_s21 }
 0x30a   :  { %13 = sbr.rel (!%p11_p7) target bundleno = 3 (0x3), region = 75 }

// kernel: transformer_generator_forward.11
= control target key start
LH: loop header
LB: loop body
LE: loop exit
PB: predicated region body
PF: predicated region fallthrough
CT: control target
= control target key end

     0   :  { %v453_v0 = vmov 0.0   ;;  %vm454_vm0 = vmmov 0   ;;  %v455_v3 = vmov 0   ;;  %v306_v27 = vlaneseq  ;;  %s566_s1 = inlined_call_operand.vmem [shape: bf16[128,384], index: 1, kind: input, shape index: {}]   ;;  %s567_s0 = inlined_call_operand.vmem [shape: bf16[16,128], index: 0, kind: input, shape index: {}]   ;;  %s568_s2 = inlined_call_operand.vmem [shape: f32[1,384], index: 2, kind: input, shape index: {}]   ;;  %s569_s3 = inlined_call_operand.vmem [shape: bf16[16,384], index: 3, kind: output, shape index: {}]  }
   0x1   :  { %397 = vmatprep.subr.bf16.mxu1 %v453_v0  ;;  %v420_v1 = vld [vmem:[%s566_s1 + $0x4] ss:$12 sps:$4 sm:$0xff]   ;;  %413 = vmatprep.mubr.msk.bf16.mxu1 %vm454_vm0, %v453_v0  ;;  %v422_v2 = vld [vmem:[%s566_s1 + $0x8] ss:$12 sps:$4 sm:$0xff]   ;;  %v423_v4 = vld [vmem:[%s566_s1] ss:$12 sps:$4 sm:$0xff]  }
   0x2   :  { %231 = vmatprep.mubr.bf16.mxu0 %v455_v3  ;;  %199 = vmatprep.subr.bf16.mxu0 %v420_v1  ;;  %v424_v5 = vld [vmem:[%s566_s1 + $0x1c] ss:$12 sps:$4 sm:$0xff]   ;;  %v426_v6 = vld [vmem:[%s566_s1 + $0x20] ss:$12 sps:$4 sm:$0xff]   ;;  %v427_v7 = vld [vmem:[%s566_s1 + $0x18] ss:$12 sps:$4 sm:$0xff]  }
   0x3   :  { %398 = vmatpush3.bf16.msra.mxu1 %v422_v2  ;;  %200 = vmatpush1.bf16.msra.mxu0 %v423_v4  ;;  %v428_v8 = vld [vmem:[%s566_s1 + $0x34] ss:$12 sps:$4 sm:$0xff]   ;;  %v430_v9 = vld [vmem:[%s566_s1 + $0x38] ss:$12 sps:$4 sm:$0xff]   ;;  %v431_v10 = vld [vmem:[%s566_s1 + $0x30] ss:$12 sps:$4 sm:$0xff]  }
   0x4   :  { %399 = vmatprep.subr.bf16.mxu1 %v453_v0  ;;  %201 = vmatprep.subr.bf16.mxu0 %v424_v5  ;;  %v432_v11 = vld [vmem:[%s566_s1 + $0x4c] ss:$12 sps:$4 sm:$0xff]   ;;  %v434_v12 = vld [vmem:[%s566_s1 + $0x50] ss:$12 sps:$4 sm:$0xff]   ;;  %v435_v13 = vld [vmem:[%s566_s1 + $0x48] ss:$12 sps:$4 sm:$0xff]  }
   0x5   :  { %v436_v14 = vld [vmem:[%s566_s1 + $0x64] ss:$12 sps:$4 sm:$0xff]   ;;  %v438_v15 = vld [vmem:[%s566_s1 + $0x68] ss:$12 sps:$4 sm:$0xff]   ;;  %v439_v16 = vld [vmem:[%s566_s1 + $0x60] ss:$12 sps:$4 sm:$0xff]  }
   0x6   :  { %v440_v17 = vld [vmem:[%s566_s1 + $0x7c] ss:$12 sps:$4 sm:$0xff]   ;;  %v442_v18 = vld [vmem:[%s566_s1 + $0x80] ss:$12 sps:$4 sm:$0xff]   ;;  %v443_v19 = vld [vmem:[%s566_s1 + $0x78] ss:$12 sps:$4 sm:$0xff]  }
   0x7   :  { %400 = vmatpush3.bf16.msra.mxu1 %v426_v6  ;;  %202 = vmatpush1.bf16.msra.mxu0 %v427_v7  ;;  %v444_v20 = vld [vmem:[%s566_s1 + $0x94] ss:$12 sps:$4 sm:$0xff]   ;;  %v446_v21 = vld [vmem:[%s566_s1 + $0x98] ss:$12 sps:$4 sm:$0xff]   ;;  %v447_v22 = vld [vmem:[%s566_s1 + $0x90] ss:$12 sps:$4 sm:$0xff]  }
   0x8   :  { %401 = vmatprep.subr.bf16.mxu1 %v453_v0  ;;  %203 = vmatprep.subr.bf16.mxu0 %v428_v8  ;;  %v448_v23 = vld [vmem:[%s566_s1 + $0xac] ss:$12 sps:$4 sm:$0xff]   ;;  %v450_v24 = vld [vmem:[%s566_s1 + $0xb0] ss:$12 sps:$4 sm:$0xff]   ;;  %v451_v25 = vld [vmem:[%s566_s1 + $0xa8] ss:$12 sps:$4 sm:$0xff]  }
   0x9   :  { %v452_v26 = vld [vmem:[%s567_s0] sm:$0xff]   ;;  %v307_v28 = vshrl.u32 %v306_v27, 7 }
   0xa   :  { %v304_v30 = vld [vmem:[%s568_s2] sm:$0x7] }
   0xb   :  { %402 = vmatpush3.bf16.msra.mxu1 %v430_v9  ;;  %204 = vmatpush1.bf16.msra.mxu0 %v431_v10  ;;  %v316_v29 = vsub.s32 2, %v307_v28  ;;  %v308_v31 = vsub.s32 0, %v307_v28  ;;  %v312_v32 = vsub.s32 1, %v307_v28 }
   0xc   :  { %403 = vmatprep.subr.bf16.mxu1 %v453_v0  ;;  %205 = vmatprep.subr.bf16.mxu0 %v432_v11 }
   0xd   :  { %v317_v33 = vrot.slane %v304_v30, %v316_v29  ;;  %v309_v34 = vrot.slane %v304_v30, %v308_v31  ;;  %v313_v35 = vrot.slane %v304_v30, %v312_v32 }
   0xf   :  { %404 = vmatpush3.bf16.msra.mxu1 %v434_v12  ;;  %206 = vmatpush1.bf16.msra.mxu0 %v435_v13 }
  0x10   :  { %405 = vmatprep.subr.bf16.mxu1 %v453_v0  ;;  %207 = vmatprep.subr.bf16.mxu0 %v436_v14 }
  0x13   :  { %406 = vmatpush3.bf16.msra.mxu1 %v438_v15  ;;  %208 = vmatpush1.bf16.msra.mxu0 %v439_v16 }
  0x14   :  { %407 = vmatprep.subr.bf16.mxu1 %v453_v0  ;;  %209 = vmatprep.subr.bf16.mxu0 %v440_v17 }
  0x17   :  { %408 = vmatpush3.bf16.msra.mxu1 %v442_v18  ;;  %210 = vmatpush1.bf16.msra.mxu0 %v443_v19 }
  0x18   :  { %409 = vmatprep.subr.bf16.mxu1 %v453_v0  ;;  %211 = vmatprep.subr.bf16.mxu0 %v444_v20 }
  0x1b   :  { %410 = vmatpush3.bf16.msra.mxu1 %v446_v21  ;;  %212 = vmatpush1.bf16.msra.mxu0 %v447_v22 }
  0x1c   :  { %411 = vmatprep.subr.bf16.mxu1 %v453_v0  ;;  %213 = vmatprep.subr.bf16.mxu0 %v448_v23 }
  0x1f   :  { %412 = vmatpush3.bf16.msra.mxu1 %v450_v24  ;;  %214 = vmatpush1.bf16.msra.mxu0 %v451_v25 }
  0x22   :  { %414 = vmatmul.mubr.bf16.vlgmr.msra.gmra.mrb[0].mxu1 %v452_v26  ;;  %232 = vmatmul.mubr.bf16.vlgmr.msra.gmra.mrb[0].mxu0 %v452_v26 }
  0xf5   :  { %v276_v36 = vpop.f32.mrb[0].mxu1  ;;  %v233_v38 = vpop.f32.mrb[0].mxu0 }
  0xf6   :  { %v323_v37 = vadd.f32 %v317_v33, %v276_v36  ;;  %v415_v39 = vpop.f32.mrb[1].mxu1  ;;  %v321_v40 = vadd.f32 %v309_v34, %v233_v38  ;;  %v235_v41 = vpop.f32.mrb[1].mxu0 }
  0xf7   :  { %v279_v42 = vpop.f32.mrb[2].mxu1  ;;  %v322_v44 = vadd.f32 %v313_v35, %v235_v41  ;;  %v237_v46 = vpop.f32.mrb[2].mxu0 }
  0xf8   :  { %v385_v43 = vpack.c.bf16 %v323_v37, %v323_v37  ;;  %v326_v45 = vadd.f32 %v317_v33, %v279_v42  ;;  %v416_v47 = vpop.f32.mrb[3].mxu1  ;;  %v324_v48 = vadd.f32 %v309_v34, %v237_v46  ;;  %v239_v49 = vpop.f32.mrb[3].mxu0 }
  0xf9   :  { %v384_v50 = vpack.c.bf16 %v322_v44, %v321_v40  ;;  %v325_v52 = vadd.f32 %v313_v35, %v239_v49 }
  0xfa   :  { %348 = vst [vmem:[%s569_s3 + $0x8] sm:$0xf] %v385_v43  ;;  %v387_v51 = vpack.c.bf16 %v326_v45, %v326_v45 }
  0xfb   :  { %347 = vst [vmem:[%s569_s3] sm:$0xff] %v384_v50  ;;  %v386_v53 = vpack.c.bf16 %v325_v52, %v324_v48 }
  0xfc   :  { %350 = vst [vmem:[%s569_s3 + $0x14] sm:$0xf] %v387_v51 }
  0xfd   :  { %349 = vst [vmem:[%s569_s3 + $0xc] sm:$0xff] %v386_v53 }

// kernel: transformer_generator_forward.13
= control target key start
LH: loop header
LB: loop body
LE: loop exit
PB: predicated region body
PF: predicated region fallthrough
CT: control target
= control target key end

     0   :  { %v293_v0 = vmov 0.0   ;;  %vm294_vm0 = vmmov 0   ;;  %s372_s1 = inlined_call_operand.vmem [shape: bf16[128,128], index: 1, kind: input, shape index: {}]   ;;  %s373_s0 = inlined_call_operand.vmem [shape: bf16[16,128], index: 0, kind: input, shape index: {}]   ;;  %s374_s3 = inlined_call_operand.vmem [shape: bf16[16,128], index: 3, kind: input, shape index: {}]   ;;  %s375_s2 = inlined_call_operand.vmem [shape: f32[1,128], index: 2, kind: input, shape index: {}]   ;;  %s376_s4 = inlined_call_operand.vmem [shape: f32[1,128], index: 4, kind: input, shape index: {}]   ;;  %s377_s5 = inlined_call_operand.vmem [shape: f32[1,128], index: 5, kind: input, shape index: {}]   ;;  %s378_s6 = inlined_call_operand.vmem [shape: bf16[16,128], index: 6, kind: output, shape index: {}]  }
   0x1   :  { %258 = vmatprep.subr.bf16.mxu0 %v293_v0  ;;  %v280_v1 = vld [vmem:[%s372_s1] sm:$0xff]   ;;  %274 = vmatprep.mubr.msk.bf16.mxu0 %vm294_vm0, %v293_v0  ;;  %v281_v2 = vld [vmem:[%s372_s1 + $0x8] sm:$0xff]   ;;  %v282_v3 = vld [vmem:[%s372_s1 + $0x10] sm:$0xff]  }
   0x2   :  { %259 = vmatpush3.bf16.msra.mxu0 %v280_v1  ;;  %v283_v4 = vld [vmem:[%s372_s1 + $0x18] sm:$0xff]   ;;  %v284_v5 = vld [vmem:[%s372_s1 + $0x20] sm:$0xff]   ;;  %v285_v6 = vld [vmem:[%s372_s1 + $0x28] sm:$0xff]  }
   0x3   :  { %260 = vmatprep.subr.bf16.mxu0 %v293_v0  ;;  %v286_v7 = vld [vmem:[%s372_s1 + $0x30] sm:$0xff]   ;;  %v287_v8 = vld [vmem:[%s372_s1 + $0x38] sm:$0xff]   ;;  %v288_v9 = vld [vmem:[%s373_s0] sm:$0xff]  }
   0x4   :  { %v241_v10 = vld [vmem:[%s374_s3] sm:$0xff]  }
   0x5   :  { %v233_v11 = vld [vmem:[%s375_s2] ss:$0 sm:$0xff]  ;;  %v242_v12 = vunpack.c.l.bf16 %v241_v10  ;;  %v243_v20 = vunpack.c.h.bf16 %v241_v10 }
   0x6   :  { %261 = vmatpush3.bf16.msra.mxu0 %v281_v2  ;;  %v234_v38 = vld [vmem:[%s376_s4] ss:$0 sm:$0xff] }
   0x7   :  { %262 = vmatprep.subr.bf16.mxu0 %v293_v0  ;;  %v235_v42 = vld [vmem:[%s377_s5] ss:$0 sm:$0xff] }
   0xa   :  { %263 = vmatpush3.bf16.msra.mxu0 %v282_v3 }
   0xb   :  { %264 = vmatprep.subr.bf16.mxu0 %v293_v0 }
   0xe   :  { %265 = vmatpush3.bf16.msra.mxu0 %v283_v4 }
   0xf   :  { %266 = vmatprep.subr.bf16.mxu0 %v293_v0 }
  0x12   :  { %267 = vmatpush3.bf16.msra.mxu0 %v284_v5 }
  0x13   :  { %268 = vmatprep.subr.bf16.mxu0 %v293_v0 }
  0x16   :  { %269 = vmatpush3.bf16.msra.mxu0 %v285_v6 }
  0x17   :  { %270 = vmatprep.subr.bf16.mxu0 %v293_v0 }
  0x1a   :  { %271 = vmatpush3.bf16.msra.mxu0 %v286_v7 }
  0x1b   :  { %272 = vmatprep.subr.bf16.mxu0 %v293_v0 }
  0x1e   :  { %273 = vmatpush3.bf16.msra.mxu0 %v287_v8 }
  0x21   :  { %275 = vmatmul.mubr.bf16.vlgmr.msra.gmra.mrb[0].mxu0 %v288_v9 }
  0xf4   :  { %v138_v13 = vpop.f32.mrb[0].mxu0 }
  0xf5   :  { %v161_v14 = vadd.f32 %v233_v11, %v138_v13  ;;  %v276_v15 = vpop.f32.mrb[1].mxu0 }
  0xf6   :  { %v141_v16 = vpop.f32.mrb[2].mxu0 }
  0xf7   :  { %v162_v17 = vadd.f32 %v233_v11, %v141_v16  ;;  %v277_v18 = vpop.f32.mrb[3].mxu0  ;;  %v167_v19 = vadd.f32 %v242_v12, %v161_v14 }
  0xf9   :  { %169 = vadd.xlane.f32.xlu0 %v167_v19  ;;  %v168_v21 = vadd.f32 %v243_v20, %v162_v17 }
  0xfd   :  { %171 = vadd.xlane.f32.xlu0 %v168_v21 }
 0x186   :  { %v170_v22 = vpop.xlane.xlu0 %169 }
 0x187   :  { %v174_v23 = vmul.f32 0.0078125, %v170_v22 }
 0x189   :  { %v176_v24 = vsub.f32 %v167_v19, %v174_v23 }
 0x18a   :  { %v172_v25 = vpop.xlane.xlu0 %171 }
 0x18b   :  { %v175_v26 = vmul.f32 0.0078125, %v172_v25  ;;  %v178_v27 = vmul.f32 %v176_v24, %v176_v24 }
 0x18d   :  { %v177_v28 = vsub.f32 %v168_v21, %v175_v26  ;;  %180 = vadd.xlane.f32.xlu1 %v178_v27 }
 0x18f   :  { %v179_v29 = vmul.f32 %v177_v28, %v177_v28 }
 0x191   :  { %182 = vadd.xlane.f32.xlu1 %v179_v29 }
 0x21a   :  { %v181_v30 = vpop.xlane.xlu1 %180 }
 0x21b   :  { %v184_v31 = vmul.f32 0.0078125, %v181_v30 }
 0x21d   :  { %v186_v32 = vadd.f32 1e-05, %v184_v31 }
 0x21e   :  { %v183_v33 = vpop.xlane.xlu1 %182 }
 0x21f   :  { %289 = vrsqrt.f32 %v186_v32  ;;  %v185_v34 = vmul.f32 0.0078125, %v183_v33 }
 0x221   :  { %v187_v35 = vadd.f32 1e-05, %v185_v34 }
 0x223   :  { %291 = vrsqrt.f32 %v187_v35 }
 0x229   :  { %v290_v36 = vpop.eup %289 }
 0x22a   :  { %v190_v37 = vmul.f32 %v290_v36, %v176_v24 }
 0x22c   :  { %v199_v40 = vmul.f32 %v234_v38, %v190_v37 }
 0x22d   :  { %v292_v39 = vpop.eup %291 }
 0x22e   :  { %v191_v41 = vmul.f32 %v292_v39, %v177_v28  ;;  %v208_v44 = vadd.f32 %v235_v42, %v199_v40 }
 0x230   :  { %v200_v43 = vmul.f32 %v234_v38, %v191_v41 }
 0x232   :  { %v209_v45 = vadd.f32 %v235_v42, %v200_v43 }
 0x234   :  { %v247_v46 = vpack.c.bf16 %v209_v45, %v208_v44 }
 0x236   :  { %248 = vst [vmem:[%s378_s6] sm:$0xff] %v247_v46  }

// kernel: transformer_generator_forward.14
= control target key start
LH: loop header
LB: loop body
LE: loop exit
PB: predicated region body
PF: predicated region fallthrough
CT: control target
= control target key end

     0   :  { %v274_v1 = vmov 0   ;;  %v191_v18 = vlaneseq  ;;  %s355_s1 = inlined_call_operand.vmem [shape: bf16[128,256], index: 1, kind: input, shape index: {}]   ;;  %s356_s0 = inlined_call_operand.vmem [shape: bf16[16,128], index: 0, kind: input, shape index: {}]   ;;  %s357_s2 = inlined_call_operand.vmem [shape: f32[1,256], index: 2, kind: input, shape index: {}]   ;;  %s358_s3 = inlined_call_operand.vmem [shape: bf16[16,256], index: 3, kind: output, shape index: {}]  }
   0x1   :  { %v249_v0 = vld [vmem:[%s355_s1 + $0x4] ss:$8 sps:$4 sm:$0xff]   ;;  %163 = vmatprep.mubr.bf16.mxu0 %v274_v1  ;;  %v251_v2 = vld [vmem:[%s355_s1] ss:$8 sps:$4 sm:$0xff]   ;;  %v252_v3 = vld [vmem:[%s355_s1 + $0x14] ss:$8 sps:$4 sm:$0xff]  }
   0x2   :  { %131 = vmatprep.subr.bf16.mxu0 %v249_v0  ;;  %v254_v4 = vld [vmem:[%s355_s1 + $0x10] ss:$8 sps:$4 sm:$0xff]   ;;  %v255_v5 = vld [vmem:[%s355_s1 + $0x24] ss:$8 sps:$4 sm:$0xff]   ;;  %v257_v6 = vld [vmem:[%s355_s1 + $0x20] ss:$8 sps:$4 sm:$0xff]  }
   0x3   :  { %132 = vmatpush1.bf16.msra.mxu0 %v251_v2  ;;  %v258_v7 = vld [vmem:[%s355_s1 + $0x34] ss:$8 sps:$4 sm:$0xff]   ;;  %v260_v8 = vld [vmem:[%s355_s1 + $0x30] ss:$8 sps:$4 sm:$0xff]   ;;  %v261_v9 = vld [vmem:[%s355_s1 + $0x44] ss:$8 sps:$4 sm:$0xff]  }
   0x4   :  { %133 = vmatprep.subr.bf16.mxu0 %v252_v3  ;;  %v263_v10 = vld [vmem:[%s355_s1 + $0x40] ss:$8 sps:$4 sm:$0xff]   ;;  %v264_v11 = vld [vmem:[%s355_s1 + $0x54] ss:$8 sps:$4 sm:$0xff]   ;;  %v266_v12 = vld [vmem:[%s355_s1 + $0x50] ss:$8 sps:$4 sm:$0xff]  }
   0x5   :  { %v267_v13 = vld [vmem:[%s355_s1 + $0x64] ss:$8 sps:$4 sm:$0xff]   ;;  %v269_v14 = vld [vmem:[%s355_s1 + $0x60] ss:$8 sps:$4 sm:$0xff]   ;;  %v270_v15 = vld [vmem:[%s355_s1 + $0x74] ss:$8 sps:$4 sm:$0xff]  }
   0x6   :  { %v272_v16 = vld [vmem:[%s355_s1 + $0x70] ss:$8 sps:$4 sm:$0xff]   ;;  %v273_v17 = vld [vmem:[%s356_s0] sm:$0xff]   ;;  %v192_v19 = vshrl.u32 %v191_v18, 7 }
   0x7   :  { %134 = vmatpush1.bf16.msra.mxu0 %v254_v4  ;;  %v189_v21 = vld [vmem:[%s357_s2] sm:$0x3] }
   0x8   :  { %135 = vmatprep.subr.bf16.mxu0 %v255_v5  ;;  %v193_v20 = vsub.s32 0, %v192_v19  ;;  %v197_v22 = vsub.s32 1, %v192_v19 }
   0xa   :  { %v194_v23 = vrot.slane %v189_v21, %v193_v20  ;;  %v198_v24 = vrot.slane %v189_v21, %v197_v22 }
   0xb   :  { %136 = vmatpush1.bf16.msra.mxu0 %v257_v6 }
   0xc   :  { %137 = vmatprep.subr.bf16.mxu0 %v258_v7 }
   0xf   :  { %138 = vmatpush1.bf16.msra.mxu0 %v260_v8 }
  0x10   :  { %139 = vmatprep.subr.bf16.mxu0 %v261_v9 }
  0x13   :  { %140 = vmatpush1.bf16.msra.mxu0 %v263_v10 }
  0x14   :  { %141 = vmatprep.subr.bf16.mxu0 %v264_v11 }
  0x17   :  { %142 = vmatpush1.bf16.msra.mxu0 %v266_v12 }
  0x18   :  { %143 = vmatprep.subr.bf16.mxu0 %v267_v13 }
  0x1b   :  { %144 = vmatpush1.bf16.msra.mxu0 %v269_v14 }
  0x1c   :  { %145 = vmatprep.subr.bf16.mxu0 %v270_v15 }
  0x1f   :  { %146 = vmatpush1.bf16.msra.mxu0 %v272_v16 }
  0x22   :  { %164 = vmatmul.mubr.bf16.vlgmr.msra.gmra.mrb[0].mxu0 %v273_v17 }
  0xf5   :  { %v165_v25 = vpop.f32.mrb[0].mxu0 }
  0xf6   :  { %v201_v26 = vadd.f32 %v194_v23, %v165_v25  ;;  %v167_v27 = vpop.f32.mrb[1].mxu0 }
  0xf7   :  { %v202_v28 = vadd.f32 %v198_v24, %v167_v27  ;;  %v169_v29 = vpop.f32.mrb[2].mxu0 }
  0xf8   :  { %v205_v30 = vmax.f32 %v201_v26, 0.0  ;;  %v203_v31 = vadd.f32 %v194_v23, %v169_v29  ;;  %v171_v32 = vpop.f32.mrb[3].mxu0 }
  0xf9   :  { %v206_v33 = vmax.f32 %v202_v28, 0.0  ;;  %v204_v34 = vadd.f32 %v198_v24, %v171_v32 }
  0xfa   :  { %v207_v35 = vmax.f32 %v203_v31, 0.0 }
  0xfb   :  { %v246_v36 = vpack.c.bf16 %v206_v33, %v205_v30  ;;  %v208_v37 = vmax.f32 %v204_v34, 0.0 }
  0xfd   :  { %221 = vst [vmem:[%s358_s3] sm:$0xff] %v246_v36  ;;  %v247_v38 = vpack.c.bf16 %v208_v37, %v207_v35 }
  0xff   :  { %222 = vst [vmem:[%s358_s3 + $0x8] sm:$0xff] %v247_v38 }

// kernel: transformer_generator_forward.21
= control target key start
LH: loop header
LB: loop body
LE: loop exit
PB: predicated region body
PF: predicated region fallthrough
CT: control target
= control target key end

     0   :  { %v270_v1 = vmov 0   ;;  %v191_v18 = vlaneseq  ;;  %s351_s1 = inlined_call_operand.vmem [shape: bf16[128,256], index: 1, kind: input, shape index: {}]   ;;  %s352_s0 = inlined_call_operand.vmem [shape: bf16[16,128], index: 0, kind: input, shape index: {}]   ;;  %s353_s2 = inlined_call_operand.vmem [shape: f32[1,256], index: 2, kind: input, shape index: {}]   ;;  %s354_s3 = inlined_call_operand.vmem [shape: bf16[16,256], index: 3, kind: output, shape index: {}]  }
   0x1   :  { %v245_v0 = vld [vmem:[%s351_s1 + $0x4] ss:$8 sps:$4 sm:$0xff]   ;;  %163 = vmatprep.mubr.bf16.mxu0 %v270_v1  ;;  %v247_v2 = vld [vmem:[%s351_s1] ss:$8 sps:$4 sm:$0xff]   ;;  %v248_v3 = vld [vmem:[%s351_s1 + $0x14] ss:$8 sps:$4 sm:$0xff]  }
   0x2   :  { %131 = vmatprep.subr.bf16.mxu0 %v245_v0  ;;  %v250_v4 = vld [vmem:[%s351_s1 + $0x10] ss:$8 sps:$4 sm:$0xff]   ;;  %v251_v5 = vld [vmem:[%s351_s1 + $0x24] ss:$8 sps:$4 sm:$0xff]   ;;  %v253_v6 = vld [vmem:[%s351_s1 + $0x20] ss:$8 sps:$4 sm:$0xff]  }
   0x3   :  { %132 = vmatpush1.bf16.msra.mxu0 %v247_v2  ;;  %v254_v7 = vld [vmem:[%s351_s1 + $0x34] ss:$8 sps:$4 sm:$0xff]   ;;  %v256_v8 = vld [vmem:[%s351_s1 + $0x30] ss:$8 sps:$4 sm:$0xff]   ;;  %v257_v9 = vld [vmem:[%s351_s1 + $0x44] ss:$8 sps:$4 sm:$0xff]  }
   0x4   :  { %133 = vmatprep.subr.bf16.mxu0 %v248_v3  ;;  %v259_v10 = vld [vmem:[%s351_s1 + $0x40] ss:$8 sps:$4 sm:$0xff]   ;;  %v260_v11 = vld [vmem:[%s351_s1 + $0x54] ss:$8 sps:$4 sm:$0xff]   ;;  %v262_v12 = vld [vmem:[%s351_s1 + $0x50] ss:$8 sps:$4 sm:$0xff]  }
   0x5   :  { %v263_v13 = vld [vmem:[%s351_s1 + $0x64] ss:$8 sps:$4 sm:$0xff]   ;;  %v265_v14 = vld [vmem:[%s351_s1 + $0x60] ss:$8 sps:$4 sm:$0xff]   ;;  %v266_v15 = vld [vmem:[%s351_s1 + $0x74] ss:$8 sps:$4 sm:$0xff]  }
   0x6   :  { %v268_v16 = vld [vmem:[%s351_s1 + $0x70] ss:$8 sps:$4 sm:$0xff]   ;;  %v269_v17 = vld [vmem:[%s352_s0] sm:$0xff]   ;;  %v192_v19 = vshrl.u32 %v191_v18, 7 }
   0x7   :  { %134 = vmatpush1.bf16.msra.mxu0 %v250_v4  ;;  %v189_v21 = vld [vmem:[%s353_s2] sm:$0x3] }
   0x8   :  { %135 = vmatprep.subr.bf16.mxu0 %v251_v5  ;;  %v193_v20 = vsub.s32 0, %v192_v19  ;;  %v197_v22 = vsub.s32 1, %v192_v19 }
   0xa   :  { %v194_v23 = vrot.slane %v189_v21, %v193_v20  ;;  %v198_v24 = vrot.slane %v189_v21, %v197_v22 }
   0xb   :  { %136 = vmatpush1.bf16.msra.mxu0 %v253_v6 }
   0xc   :  { %137 = vmatprep.subr.bf16.mxu0 %v254_v7 }
   0xf   :  { %138 = vmatpush1.bf16.msra.mxu0 %v256_v8 }
  0x10   :  { %139 = vmatprep.subr.bf16.mxu0 %v257_v9 }
  0x13   :  { %140 = vmatpush1.bf16.msra.mxu0 %v259_v10 }
  0x14   :  { %141 = vmatprep.subr.bf16.mxu0 %v260_v11 }
  0x17   :  { %142 = vmatpush1.bf16.msra.mxu0 %v262_v12 }
  0x18   :  { %143 = vmatprep.subr.bf16.mxu0 %v263_v13 }
  0x1b   :  { %144 = vmatpush1.bf16.msra.mxu0 %v265_v14 }
  0x1c   :  { %145 = vmatprep.subr.bf16.mxu0 %v266_v15 }
  0x1f   :  { %146 = vmatpush1.bf16.msra.mxu0 %v268_v16 }
  0x22   :  { %164 = vmatmul.mubr.bf16.vlgmr.msra.gmra.mrb[0].mxu0 %v269_v17 }
  0xf5   :  { %v165_v25 = vpop.f32.mrb[0].mxu0 }
  0xf6   :  { %v201_v26 = vadd.f32 %v194_v23, %v165_v25  ;;  %v167_v27 = vpop.f32.mrb[1].mxu0 }
  0xf7   :  { %v202_v28 = vadd.f32 %v198_v24, %v167_v27  ;;  %v169_v29 = vpop.f32.mrb[2].mxu0 }
  0xf8   :  { %v203_v30 = vadd.f32 %v194_v23, %v169_v29  ;;  %v171_v31 = vpop.f32.mrb[3].mxu0 }
  0xf9   :  { %v242_v32 = vpack.c.bf16 %v202_v28, %v201_v26  ;;  %v204_v33 = vadd.f32 %v198_v24, %v171_v31 }
  0xfb   :  { %217 = vst [vmem:[%s354_s3] sm:$0xff] %v242_v32  ;;  %v243_v34 = vpack.c.bf16 %v204_v33, %v203_v30 }
  0xfd   :  { %218 = vst [vmem:[%s354_s3 + $0x8] sm:$0xff] %v243_v34 }

// kernel: transformer_generator_forward.15
= control target key start
LH: loop header
LB: loop body
LE: loop exit
PB: predicated region body
PF: predicated region fallthrough
CT: control target
= control target key end

     0   :  { %s475_s1 = inlined_call_operand.vmem [shape: bf16[256,128], index: 1, kind: input, shape index: {}]   ;;  %s476_s0 = inlined_call_operand.vmem [shape: bf16[16,256], index: 0, kind: input, shape index: {}]   ;;  %s477_s3 = inlined_call_operand.vmem [shape: bf16[16,128], index: 3, kind: input, shape index: {}]   ;;  %s478_s2 = inlined_call_operand.vmem [shape: f32[1,128], index: 2, kind: input, shape index: {}]   ;;  %s479_s4 = inlined_call_operand.vmem [shape: f32[1,128], index: 4, kind: input, shape index: {}]   ;;  %s480_s5 = inlined_call_operand.vmem [shape: f32[1,128], index: 5, kind: input, shape index: {}]   ;;  %s481_s6 = inlined_call_operand.vmem [shape: bf16[16,128], index: 6, kind: output, shape index: {}]  }
   0x1   :  { %v348_v0 = vld [vmem:[%s475_s1 + $0x40] sm:$0xff]   ;;  %v350_v2 = vld [vmem:[%s475_s1 + $0x48] sm:$0xff]   ;;  %v352_v4 = vld [vmem:[%s475_s1 + $0x50] sm:$0xff]  }
   0x2   :  { %v349_v1 = vld [vmem:[%s475_s1] sm:$0xff]   ;;  %326 = vmatprep.subr.bf16.mxu0 %v348_v0  ;;  %v351_v3 = vld [vmem:[%s475_s1 + $0x8] sm:$0xff]   ;;  %v353_v5 = vld [vmem:[%s475_s1 + $0x10] sm:$0xff]  }
   0x3   :  { %327 = vmatpush3.bf16.msra.mxu0 %v349_v1  ;;  %v354_v6 = vld [vmem:[%s475_s1 + $0x58] sm:$0xff]   ;;  %v356_v8 = vld [vmem:[%s475_s1 + $0x60] sm:$0xff]   ;;  %v358_v10 = vld [vmem:[%s475_s1 + $0x68] sm:$0xff]  }
   0x4   :  { %328 = vmatprep.subr.bf16.mxu0 %v350_v2  ;;  %v355_v7 = vld [vmem:[%s475_s1 + $0x18] sm:$0xff]   ;;  %v357_v9 = vld [vmem:[%s475_s1 + $0x20] sm:$0xff]   ;;  %v359_v12 = vld [vmem:[%s475_s1 + $0x28] sm:$0xff]  }
   0x5   :  { %v366_v11 = vld [vmem:[%s476_s0 + $0x4] ss:$8 sps:$4 sm:$0xff]   ;;  %v360_v13 = vld [vmem:[%s475_s1 + $0x70] sm:$0xff]   ;;  %v362_v15 = vld [vmem:[%s475_s1 + $0x78] sm:$0xff]  }
   0x6   :  { %204 = vmatprep.mubr.bf16.mxu0 %v366_v11  ;;  %v361_v14 = vld [vmem:[%s475_s1 + $0x30] sm:$0xff]   ;;  %v363_v16 = vld [vmem:[%s475_s1 + $0x38] sm:$0xff]   ;;  %v364_v17 = vld [vmem:[%s476_s0] ss:$8 sps:$4 sm:$0xff]  }
   0x7   :  { %329 = vmatpush3.bf16.msra.mxu0 %v351_v3  ;;  %v318_v18 = vld [vmem:[%s477_s3] sm:$0xff]  }
   0x8   :  { %330 = vmatprep.subr.bf16.mxu0 %v352_v4  ;;  %v310_v21 = vld [vmem:[%s478_s2] ss:$0 sm:$0xff]  ;;  %v319_v24 = vunpack.c.l.bf16 %v318_v18  ;;  %v320_v30 = vunpack.c.h.bf16 %v318_v18 }
   0x9   :  { %v311_v48 = vld [vmem:[%s479_s4] ss:$0 sm:$0xff] }
   0xa   :  { %v312_v52 = vld [vmem:[%s480_s5] ss:$0 sm:$0xff] }
   0xb   :  { %331 = vmatpush3.bf16.msra.mxu0 %v353_v5 }
   0xc   :  { %332 = vmatprep.subr.bf16.mxu0 %v354_v6 }
   0xf   :  { %333 = vmatpush3.bf16.msra.mxu0 %v355_v7 }
  0x10   :  { %334 = vmatprep.subr.bf16.mxu0 %v356_v8 }
  0x13   :  { %335 = vmatpush3.bf16.msra.mxu0 %v357_v9 }
  0x14   :  { %336 = vmatprep.subr.bf16.mxu0 %v358_v10 }
  0x17   :  { %337 = vmatpush3.bf16.msra.mxu0 %v359_v12 }
  0x18   :  { %338 = vmatprep.subr.bf16.mxu0 %v360_v13 }
  0x1b   :  { %339 = vmatpush3.bf16.msra.mxu0 %v361_v14 }
  0x1c   :  { %340 = vmatprep.subr.bf16.mxu0 %v362_v15 }
  0x1f   :  { %341 = vmatpush3.bf16.msra.mxu0 %v363_v16 }
  0x22   :  { %205 = vmatmul.mubr.bf16.vlgmr.msra.gmra.mrb[0].mxu0 %v364_v17 }
  0xf5   :  { %v342_v19 = vpop.f32.mrb[0].mxu0 }
  0xf6   :  { %v343_v20 = vpop.f32.mrb[1].mxu0 }
  0xf7   :  { %v344_v22 = vadd.f32 %v343_v20, %v342_v19  ;;  %v345_v23 = vpop.f32.mrb[2].mxu0 }
  0xf8   :  { %v346_v25 = vpop.f32.mrb[3].mxu0 }
  0xf9   :  { %v229_v26 = vadd.f32 %v344_v22, %v310_v21  ;;  %v347_v27 = vadd.f32 %v346_v25, %v345_v23 }
  0xfb   :  { %v230_v28 = vadd.f32 %v347_v27, %v310_v21  ;;  %v235_v29 = vadd.f32 %v319_v24, %v229_v26 }
  0xfd   :  { %237 = vadd.xlane.f32.xlu0 %v235_v29  ;;  %v236_v31 = vadd.f32 %v320_v30, %v230_v28 }
 0x101   :  { %239 = vadd.xlane.f32.xlu0 %v236_v31 }
 0x18a   :  { %v238_v32 = vpop.xlane.xlu0 %237 }
 0x18b   :  { %v242_v33 = vmul.f32 0.0078125, %v238_v32 }
 0x18d   :  { %v244_v34 = vsub.f32 %v235_v29, %v242_v33 }
 0x18e   :  { %v240_v35 = vpop.xlane.xlu0 %239 }
 0x18f   :  { %v243_v36 = vmul.f32 0.0078125, %v240_v35  ;;  %v246_v37 = vmul.f32 %v244_v34, %v244_v34 }
 0x191   :  { %v245_v38 = vsub.f32 %v236_v31, %v243_v36  ;;  %248 = vadd.xlane.f32.xlu1 %v246_v37 }
 0x193   :  { %v247_v39 = vmul.f32 %v245_v38, %v245_v38 }
 0x195   :  { %250 = vadd.xlane.f32.xlu1 %v247_v39 }
 0x21e   :  { %v249_v40 = vpop.xlane.xlu1 %248 }
 0x21f   :  { %v252_v41 = vmul.f32 0.0078125, %v249_v40 }
 0x221   :  { %v254_v42 = vadd.f32 1e-05, %v252_v41 }
 0x222   :  { %v251_v43 = vpop.xlane.xlu1 %250 }
 0x223   :  { %367 = vrsqrt.f32 %v254_v42  ;;  %v253_v44 = vmul.f32 0.0078125, %v251_v43 }
 0x225   :  { %v255_v45 = vadd.f32 1e-05, %v253_v44 }
 0x227   :  { %369 = vrsqrt.f32 %v255_v45 }
 0x22d   :  { %v368_v46 = vpop.eup %367 }
 0x22e   :  { %v258_v47 = vmul.f32 %v368_v46, %v244_v34 }
 0x230   :  { %v267_v50 = vmul.f32 %v311_v48, %v258_v47 }
 0x231   :  { %v370_v49 = vpop.eup %369 }
 0x232   :  { %v259_v51 = vmul.f32 %v370_v49, %v245_v38  ;;  %v276_v54 = vadd.f32 %v312_v52, %v267_v50 }
 0x234   :  { %v268_v53 = vmul.f32 %v311_v48, %v259_v51 }
 0x236   :  { %v277_v55 = vadd.f32 %v312_v52, %v268_v53 }
 0x238   :  { %v324_v56 = vpack.c.bf16 %v277_v55, %v276_v54 }
 0x23a   :  { %325 = vst [vmem:[%s481_s6] sm:$0xff] %v324_v56  }

</bundles_post_ra>
